<compile_context>
chip_gen: v6e
topology: v6e:2x2x1
jax: 0.10.0
libtpu: 0.0.40
codegen_flags: <defaults>
</compile_context>

<pallas_src>
import functools

import jax
import jax.numpy as jnp
from jax.experimental import pallas as pl
from jax.experimental.pallas import tpu as pltpu


# ----------------------------------------------------------------------------
# Fused kernel: deconstruction_nn + agent decoder (+ optional global decoder)
# ----------------------------------------------------------------------------
def _state_decoder_kernel(with_u,
                          th_ref, s_ref, cf_ref, pa_ref,
                          w1h_ref, w1s_ref, w1i_ref, w1a_ref, b1_ref,
                          w2_ref, b2_ref, w3_ref, b3_ref,
                          wd_ref, bd_ref, wmu_ref, bmu_ref,
                          *tail):
    if with_u:
        (wdu_ref, bdu_ref, wmuu_ref, bmuu_ref,
         agent_mean_ref, u_mean_ref) = tail
    else:
        (agent_mean_ref,) = tail

    f32 = jnp.float32

    # --- deconstruction_nn -------------------------------------------------
    # Layer 1: concat([theta, s, flag, acts]) @ W1 is computed as partial dots
    # over the row-blocks of W1 (flag column is a rank-1 outer product on VPU).
    h1 = jnp.dot(th_ref[...], w1h_ref[...], preferred_element_type=f32)
    h1 = h1 + jnp.dot(s_ref[...], w1s_ref[...], preferred_element_type=f32)
    h1 = h1 + jnp.dot(pa_ref[...], w1a_ref[...], preferred_element_type=f32)
    h1 = h1 + cf_ref[...] * w1i_ref[...]                     # (rows,1)*(1,H1)
    h1 = jnp.maximum(h1 + b1_ref[...], 0.0)
    h2 = jnp.maximum(
        jnp.dot(h1, w2_ref[...], preferred_element_type=f32) + b2_ref[...], 0.0)
    n = jnp.dot(h2, w3_ref[...], preferred_element_type=f32) + b3_ref[...]

    # --- agent decoder (mean head only; variance is replaced by ones) -------
    d = jnp.maximum(
        jnp.dot(n, wd_ref[...], preferred_element_type=f32) + bd_ref[...], 0.0)
    agent_mean_ref[...] = (
        jnp.dot(d, wmu_ref[...], preferred_element_type=f32) + bmu_ref[...])

    # --- global feature path (sum over num_agents + decoder_u) --------------
    if with_u:
        rows = agent_mean_ref.shape[0]      # tile_bp * NA
        groups = u_mean_ref.shape[0]        # tile_bp
        na = rows // groups
        # Grouped sum over NA consecutive rows via a block summation matrix on
        # the MXU (no in-kernel 3-D reshape / middle-axis reduce relayout).
        col = jax.lax.broadcasted_iota(jnp.int32, (groups, rows), 1)
        grp = jax.lax.broadcasted_iota(jnp.int32, (groups, rows), 0)
        lo = grp * na
        ssum = ((col >= lo) & (col < lo + na)).astype(f32)
        u = jnp.dot(ssum, n, preferred_element_type=f32)
        du = jnp.maximum(
            jnp.dot(u, wdu_ref[...], preferred_element_type=f32) + bdu_ref[...], 0.0)
        u_mean_ref[...] = (
            jnp.dot(du, wmuu_ref[...], preferred_element_type=f32) + bmuu_ref[...])


def _pick_tile_bp(bp, max_tile_bp):
    """Largest multiple-of-8 divisor of bp (<= max_tile_bp) that keeps >=2 grid steps."""
    cands = [t for t in range(8, min(bp, max_tile_bp) + 1, 8) if bp % t == 0]
    if not cands:
        return bp                      # tiny / awkward bp: one block covers everything
    multi = [t for t in cands if bp // t >= 2]
    return max(multi) if multi else max(cands)


# ----------------------------------------------------------------------------
# Wrapper
# ----------------------------------------------------------------------------
def state_decoder_forward(theta, s, cur_flag, prev_acts, params,
                          with_global_feature=True, max_tile_bp=256):
    B, P, NA, h_dim = theta.shape
    s_dim = s.shape[-1]
    act_enc = prev_acts.shape[-1]
    BP = B * P
    rows = BP * NA

    # Contiguous reshapes (bitcast, no copy): NA consecutive rows = one (b,p) group.
    th2 = theta.reshape(rows, h_dim)
    s2 = s.reshape(rows, s_dim)
    cf2 = cur_flag.reshape(rows, 1)
    pa2 = prev_acts.reshape(rows, act_enc)

    # Split W1 along its input rows (matches torch.cat order [theta, s, flag, acts]).
    w1 = params["w1"]
    w1h = w1[:h_dim]
    w1s = w1[h_dim:h_dim + s_dim]
    w1i = w1[h_dim + s_dim:h_dim + s_dim + 1]
    w1a = w1[h_dim + s_dim + 1:]

    tile_bp = _pick_tile_bp(BP, max_tile_bp)
    tile_rows = tile_bp * NA
    grid = (BP // tile_bp,)

    a_dim = params["wmu"].shape[-1]

    def row_spec(feat):
        return pl.BlockSpec((tile_rows, feat), lambda i: (i, 0))

    def full_spec(arr):
        return pl.BlockSpec(arr.shape, lambda i: (0, 0))

    inputs = [th2, s2, cf2, pa2,
              w1h, w1s, w1i, w1a, params["b1"],
              params["w2"], params["b2"], params["w3"], params["b3"],
              params["wd"], params["bd"], params["wmu"], params["bmu"]]
    in_specs = [row_spec(h_dim), row_spec(s_dim), row_spec(1), row_spec(act_enc)]
    in_specs += [full_spec(a) for a in inputs[4:]]

    out_specs = [pl.BlockSpec((tile_rows, a_dim), lambda i: (i, 0))]
    out_shape = [jax.ShapeDtypeStruct((rows, a_dim), jnp.float32)]

    if with_global_feature:
        u_dim = params["wmu_u"].shape[-1]
        extra = [params["wd_u"], params["bd_u"], params["wmu_u"], params["bmu_u"]]
        inputs += extra
        in_specs += [full_spec(a) for a in extra]
        out_specs.append(pl.BlockSpec((tile_bp, u_dim), lambda i: (i, 0)))
        out_shape.append(jax.ShapeDtypeStruct((BP, u_dim), jnp.float32))

    kernel = functools.partial(_state_decoder_kernel, with_global_feature)

    outs = pl.pallas_call(
        kernel,
        grid=grid,
        in_specs=in_specs,
        out_specs=tuple(out_specs),
        out_shape=tuple(out_shape),
        compiler_params=pltpu.CompilerParams(
            dimension_semantics=("parallel",)),
    )(*inputs)

    if with_global_feature:
        agent_mean_flat, u_mean_flat = outs
    else:
        (agent_mean_flat,) = outs
        u_mean_flat = None

    agent_mean = agent_mean_flat.reshape(B, P, NA, a_dim)
    # torch: agent_var = torch.ones_like(agent_var).double()  (kept float32 here)
    agent_var = jnp.ones_like(agent_mean)

    u_mean = None
    u_var = None
    if with_global_feature:
        u_mean = u_mean_flat.reshape(B, P, -1)
        u_var = jnp.ones_like(u_mean)

    return (agent_mean, agent_var), (u_mean, u_var)


# ----------------------------------------------------------------------------
# Deterministic parameter init (torch.nn.Linear-style uniform bounds)
# ----------------------------------------------------------------------------
def init_params(key, d_in, gnn_hdim1, gnn_hdim2, decoder_hid_dims,
                agent_obs_size, u_obs_size):
    keys = iter(jax.random.split(key, 36))

    def linear(k_in, k_out):
        bound = 1.0 / (float(k_in) ** 0.5)
        w = jax.random.uniform(next(keys), (k_in, k_out), jnp.float32, -bound, bound)
        b = jax.random.uniform(next(keys), (1, k_out), jnp.float32, -bound, bound)
        return w, b

    p = {}
    # deconstruction_nn
    p["w1"], p["b1"] = linear(d_in, gnn_hdim1)
    p["w2"], p["b2"] = linear(gnn_hdim1, gnn_hdim2)
    p["w3"], p["b3"] = linear(gnn_hdim2, decoder_hid_dims[-1])
    # agent decoder
    p["wd"], p["bd"] = linear(decoder_hid_dims[-1], decoder_hid_dims[0])
    p["wmu"], p["bmu"] = linear(decoder_hid_dims[0], agent_obs_size)
    p["wvar"], p["bvar"] = linear(decoder_hid_dims[0], agent_obs_size)   # unused: var -> ones
    # global (u) decoder
    p["wd_u"], p["bd_u"] = linear(decoder_hid_dims[-1], decoder_hid_dims[0])
    p["wmu_u"], p["bmu_u"] = linear(decoder_hid_dims[0], u_obs_size)
    p["wvar_u"], p["bvar_u"] = linear(decoder_hid_dims[0], u_obs_size)   # unused: var -> ones
    return p


# ----------------------------------------------------------------------------
# Pure-JAX reference for correctness check
# ----------------------------------------------------------------------------
def reference_forward(theta, s, cur_flag, prev_acts, p):
    B, P, NA, _ = theta.shape
    x = jnp.concatenate([theta, s, cur_flag, prev_acts], axis=-1)
    x = x.reshape(-1, x.shape[-1])
    h1 = jax.nn.relu(x @ p["w1"] + p["b1"])
    h2 = jax.nn.relu(h1 @ p["w2"] + p["b2"])
    n = h2 @ p["w3"] + p["b3"]
    d = jax.nn.relu(n @ p["wd"] + p["bd"])
    agent_mean = (d @ p["wmu"] + p["bmu"]).reshape(B, P, NA, -1)
    u = n.reshape(B, P, NA, -1).sum(axis=-2).reshape(B * P, -1)
    du = jax.nn.relu(u @ p["wd_u"] + p["bd_u"])
    u_mean = (du @ p["wmu_u"] + p["bmu_u"]).reshape(B, P, -1)
    return agent_mean, u_mean


if __name__ == "__main__":
    key = jax.random.PRNGKey(0)
    kx = jax.random.split(key, 5)

    # small shapes consistent with the module's forward
    B, P, NA = 2, 32, 4                # batch, particles, num_agents  (B*P = 64 groups)
    h_dim, s_dim, act_enc = 8, 8, 4    # type vec, state vec, action encoding
    gnn_hdim1, gnn_hdim2 = 32, 32
    decoder_hid_dims = [32, 32]
    agent_obs_size, u_obs_size = 10, 6
    d_in = h_dim + s_dim + 1 + act_enc

    theta = jax.random.normal(kx[0], (B, P, NA, h_dim), jnp.float32)
    s = jax.random.normal(kx[1], (B, P, NA, s_dim), jnp.float32)
    cur_flag = (jax.random.uniform(kx[2], (B, P, NA, 1)) > 0.5).astype(jnp.float32)
    prev_acts = jax.random.normal(kx[3], (B, P, NA, act_enc), jnp.float32)

    params = init_params(kx[4], d_in, gnn_hdim1, gnn_hdim2, decoder_hid_dims,
                         agent_obs_size, u_obs_size)

    fwd = jax.jit(functools.partial(state_decoder_forward, with_global_feature=True))
    (agent_mean, agent_var), (u_mean, u_var) = fwd(theta, s, cur_flag, prev_acts, params)
    jax.block_until_ready((agent_mean, agent_var, u_mean, u_var))

    # verify against pure-JAX reference
    ref_agent_mean, ref_u_mean = reference_forward(theta, s, cur_flag, prev_acts, params)
    assert agent_mean.shape == (B, P, NA, agent_obs_size)
    assert agent_var.shape == (B, P, NA, agent_obs_size)
    assert u_mean.shape == (B, P, u_obs_size)
    assert u_var.shape == (B, P, u_obs_size)
    assert jnp.allclose(agent_mean, ref_agent_mean, rtol=1e-4, atol=1e-4)
    assert jnp.allclose(u_mean, ref_u_mean, rtol=1e-4, atol=1e-4)
    assert jnp.all(agent_var == 1.0) and jnp.all(u_var == 1.0)

    # also exercise the with_global_feature=False path
    (am2, av2), (um2, uv2) = state_decoder_forward(
        theta, s, cur_flag, prev_acts, params, with_global_feature=False)
    jax.block_until_ready(am2)
    assert um2 is None and uv2 is None
    assert jnp.allclose(am2, ref_agent_mean, rtol=1e-4, atol=1e-4)
    assert jnp.all(av2 == 1.0)

    print("KERNEL_OK")
</pallas_src>

<mosaic_0001>
module attributes {stable_mosaic.version = 11 : i64} {
  func.func @_state_decoder_kernel(%arg0: i32, %arg1: memref<128x8xf32, #tpu.memory_space<vmem>>, %arg2: memref<128x8xf32, #tpu.memory_space<vmem>>, %arg3: memref<128x1xf32, #tpu.memory_space<vmem>>, %arg4: memref<128x4xf32, #tpu.memory_space<vmem>>, %arg5: memref<8x32xf32, #tpu.memory_space<vmem>>, %arg6: memref<8x32xf32, #tpu.memory_space<vmem>>, %arg7: memref<1x32xf32, #tpu.memory_space<vmem>>, %arg8: memref<4x32xf32, #tpu.memory_space<vmem>>, %arg9: memref<1x32xf32, #tpu.memory_space<vmem>>, %arg10: memref<32x32xf32, #tpu.memory_space<vmem>>, %arg11: memref<1x32xf32, #tpu.memory_space<vmem>>, %arg12: memref<32x32xf32, #tpu.memory_space<vmem>>, %arg13: memref<1x32xf32, #tpu.memory_space<vmem>>, %arg14: memref<32x32xf32, #tpu.memory_space<vmem>>, %arg15: memref<1x32xf32, #tpu.memory_space<vmem>>, %arg16: memref<32x10xf32, #tpu.memory_space<vmem>>, %arg17: memref<1x10xf32, #tpu.memory_space<vmem>>, %arg18: memref<32x32xf32, #tpu.memory_space<vmem>>, %arg19: memref<1x32xf32, #tpu.memory_space<vmem>>, %arg20: memref<32x6xf32, #tpu.memory_space<vmem>>, %arg21: memref<1x6xf32, #tpu.memory_space<vmem>>, %arg22: memref<128x10xf32, #tpu.memory_space<vmem>>, %arg23: memref<32x6xf32, #tpu.memory_space<vmem>>) attributes {dimension_semantics = [#tpu.dimension_semantics<parallel>], iteration_bounds = array<i64: 2>, scalar_prefetch = 0 : i64, scratch_operands = 0 : i64, tpu.core_type = #tpu.core_type<tc>, window_params = [{transform_indices = @transform_0, window_bounds = array<i64: 128, 8>}, {transform_indices = @transform_1, window_bounds = array<i64: 128, 8>}, {transform_indices = @transform_2, window_bounds = array<i64: 128, 1>}, {transform_indices = @transform_3, window_bounds = array<i64: 128, 4>}, {pipeline_mode = #tpu.pipeline_mode<synchronous>, transform_indices = @transform_4, window_bounds = array<i64: 8, 32>}, {pipeline_mode = #tpu.pipeline_mode<synchronous>, transform_indices = @transform_5, window_bounds = array<i64: 8, 32>}, {pipeline_mode = #tpu.pipeline_mode<synchronous>, transform_indices = @transform_6, window_bounds = array<i64: 1, 32>}, {pipeline_mode = #tpu.pipeline_mode<synchronous>, transform_indices = @transform_7, window_bounds = array<i64: 4, 32>}, {pipeline_mode = #tpu.pipeline_mode<synchronous>, transform_indices = @transform_8, window_bounds = array<i64: 1, 32>}, {pipeline_mode = #tpu.pipeline_mode<synchronous>, transform_indices = @transform_9, window_bounds = array<i64: 32, 32>}, {pipeline_mode = #tpu.pipeline_mode<synchronous>, transform_indices = @transform_10, window_bounds = array<i64: 1, 32>}, {pipeline_mode = #tpu.pipeline_mode<synchronous>, transform_indices = @transform_11, window_bounds = array<i64: 32, 32>}, {pipeline_mode = #tpu.pipeline_mode<synchronous>, transform_indices = @transform_12, window_bounds = array<i64: 1, 32>}, {pipeline_mode = #tpu.pipeline_mode<synchronous>, transform_indices = @transform_13, window_bounds = array<i64: 32, 32>}, {pipeline_mode = #tpu.pipeline_mode<synchronous>, transform_indices = @transform_14, window_bounds = array<i64: 1, 32>}, {pipeline_mode = #tpu.pipeline_mode<synchronous>, transform_indices = @transform_15, window_bounds = array<i64: 32, 10>}, {pipeline_mode = #tpu.pipeline_mode<synchronous>, transform_indices = @transform_16, window_bounds = array<i64: 1, 10>}, {pipeline_mode = #tpu.pipeline_mode<synchronous>, transform_indices = @transform_17, window_bounds = array<i64: 32, 32>}, {pipeline_mode = #tpu.pipeline_mode<synchronous>, transform_indices = @transform_18, window_bounds = array<i64: 1, 32>}, {pipeline_mode = #tpu.pipeline_mode<synchronous>, transform_indices = @transform_19, window_bounds = array<i64: 32, 6>}, {pipeline_mode = #tpu.pipeline_mode<synchronous>, transform_indices = @transform_20, window_bounds = array<i64: 1, 6>}, {transform_indices = @transform_21, window_bounds = array<i64: 128, 10>}, {transform_indices = @transform_22, window_bounds = array<i64: 32, 6>}]} {
    %c0 = arith.constant 0 : index
    %c0_0 = arith.constant 0 : index
    %0 = vector.load %arg1[%c0, %c0_0] : memref<128x8xf32, #tpu.memory_space<vmem>>, vector<128x8xf32>
    %c0_1 = arith.constant 0 : index
    %c0_2 = arith.constant 0 : index
    %1 = vector.load %arg5[%c0_1, %c0_2] : memref<8x32xf32, #tpu.memory_space<vmem>>, vector<8x32xf32>
    %cst = arith.constant dense<0.000000e+00> : vector<128x32xf32>
    %2 = tpu.matmul %0, %1, %cst {dimension_numbers = #tpu.dot_dimension_numbers<[1], [0], [0], [1], [0, 0, 1, 1], [], []>} : vector<128x8xf32>, vector<8x32xf32>, vector<128x32xf32> -> vector<128x32xf32>
    %c0_3 = arith.constant 0 : index
    %c0_4 = arith.constant 0 : index
    %3 = vector.load %arg2[%c0_3, %c0_4] : memref<128x8xf32, #tpu.memory_space<vmem>>, vector<128x8xf32>
    %c0_5 = arith.constant 0 : index
    %c0_6 = arith.constant 0 : index
    %4 = vector.load %arg6[%c0_5, %c0_6] : memref<8x32xf32, #tpu.memory_space<vmem>>, vector<8x32xf32>
    %cst_7 = arith.constant dense<0.000000e+00> : vector<128x32xf32>
    %5 = tpu.matmul %3, %4, %cst_7 {dimension_numbers = #tpu.dot_dimension_numbers<[1], [0], [0], [1], [0, 0, 1, 1], [], []>} : vector<128x8xf32>, vector<8x32xf32>, vector<128x32xf32> -> vector<128x32xf32>
    %6 = arith.addf %2, %5 : vector<128x32xf32>
    %c0_8 = arith.constant 0 : index
    %c0_9 = arith.constant 0 : index
    %7 = vector.load %arg4[%c0_8, %c0_9] : memref<128x4xf32, #tpu.memory_space<vmem>>, vector<128x4xf32>
    %c0_10 = arith.constant 0 : index
    %c0_11 = arith.constant 0 : index
    %8 = vector.load %arg8[%c0_10, %c0_11] : memref<4x32xf32, #tpu.memory_space<vmem>>, vector<4x32xf32>
    %cst_12 = arith.constant dense<0.000000e+00> : vector<128x32xf32>
    %9 = tpu.matmul %7, %8, %cst_12 {dimension_numbers = #tpu.dot_dimension_numbers<[1], [0], [0], [1], [0, 0, 1, 1], [], []>} : vector<128x4xf32>, vector<4x32xf32>, vector<128x32xf32> -> vector<128x32xf32>
    %10 = arith.addf %6, %9 : vector<128x32xf32>
    %c0_13 = arith.constant 0 : index
    %c0_14 = arith.constant 0 : index
    %11 = vector.load %arg3[%c0_13, %c0_14] : memref<128x1xf32, #tpu.memory_space<vmem>>, vector<128x1xf32>
    %c0_15 = arith.constant 0 : index
    %c0_16 = arith.constant 0 : index
    %12 = vector.load %arg7[%c0_15, %c0_16] : memref<1x32xf32, #tpu.memory_space<vmem>>, vector<1x32xf32>
    %13 = vector.broadcast %11 : vector<128x1xf32> to vector<128x32xf32>
    %14 = vector.broadcast %12 : vector<1x32xf32> to vector<128x32xf32>
    %15 = arith.mulf %13, %14 : vector<128x32xf32>
    %16 = arith.addf %10, %15 : vector<128x32xf32>
    %c0_17 = arith.constant 0 : index
    %c0_18 = arith.constant 0 : index
    %17 = vector.load %arg9[%c0_17, %c0_18] : memref<1x32xf32, #tpu.memory_space<vmem>>, vector<1x32xf32>
    %18 = vector.broadcast %17 : vector<1x32xf32> to vector<128x32xf32>
    %19 = arith.addf %16, %18 : vector<128x32xf32>
    %cst_19 = arith.constant 0.000000e+00 : f32
    %20 = vector.broadcast %cst_19 : f32 to vector<128x32xf32>
    %21 = arith.maximumf %19, %20 : vector<128x32xf32>
    %c0_20 = arith.constant 0 : index
    %c0_21 = arith.constant 0 : index
    %22 = vector.load %arg10[%c0_20, %c0_21] : memref<32x32xf32, #tpu.memory_space<vmem>>, vector<32x32xf32>
    %cst_22 = arith.constant dense<0.000000e+00> : vector<128x32xf32>
    %23 = tpu.matmul %21, %22, %cst_22 {dimension_numbers = #tpu.dot_dimension_numbers<[1], [0], [0], [1], [0, 0, 1, 1], [], []>} : vector<128x32xf32>, vector<32x32xf32>, vector<128x32xf32> -> vector<128x32xf32>
    %c0_23 = arith.constant 0 : index
    %c0_24 = arith.constant 0 : index
    %24 = vector.load %arg11[%c0_23, %c0_24] : memref<1x32xf32, #tpu.memory_space<vmem>>, vector<1x32xf32>
    %25 = vector.broadcast %24 : vector<1x32xf32> to vector<128x32xf32>
    %26 = arith.addf %23, %25 : vector<128x32xf32>
    %cst_25 = arith.constant 0.000000e+00 : f32
    %27 = vector.broadcast %cst_25 : f32 to vector<128x32xf32>
    %28 = arith.maximumf %26, %27 : vector<128x32xf32>
    %c0_26 = arith.constant 0 : index
    %c0_27 = arith.constant 0 : index
    %29 = vector.load %arg12[%c0_26, %c0_27] : memref<32x32xf32, #tpu.memory_space<vmem>>, vector<32x32xf32>
    %cst_28 = arith.constant dense<0.000000e+00> : vector<128x32xf32>
    %30 = tpu.matmul %28, %29, %cst_28 {dimension_numbers = #tpu.dot_dimension_numbers<[1], [0], [0], [1], [0, 0, 1, 1], [], []>} : vector<128x32xf32>, vector<32x32xf32>, vector<128x32xf32> -> vector<128x32xf32>
    %c0_29 = arith.constant 0 : index
    %c0_30 = arith.constant 0 : index
    %31 = vector.load %arg13[%c0_29, %c0_30] : memref<1x32xf32, #tpu.memory_space<vmem>>, vector<1x32xf32>
    %32 = vector.broadcast %31 : vector<1x32xf32> to vector<128x32xf32>
    %33 = arith.addf %30, %32 : vector<128x32xf32>
    %c0_31 = arith.constant 0 : index
    %c0_32 = arith.constant 0 : index
    %34 = vector.load %arg14[%c0_31, %c0_32] : memref<32x32xf32, #tpu.memory_space<vmem>>, vector<32x32xf32>
    %cst_33 = arith.constant dense<0.000000e+00> : vector<128x32xf32>
    %35 = tpu.matmul %33, %34, %cst_33 {dimension_numbers = #tpu.dot_dimension_numbers<[1], [0], [0], [1], [0, 0, 1, 1], [], []>} : vector<128x32xf32>, vector<32x32xf32>, vector<128x32xf32> -> vector<128x32xf32>
    %c0_34 = arith.constant 0 : index
    %c0_35 = arith.constant 0 : index
    %36 = vector.load %arg15[%c0_34, %c0_35] : memref<1x32xf32, #tpu.memory_space<vmem>>, vector<1x32xf32>
    %37 = vector.broadcast %36 : vector<1x32xf32> to vector<128x32xf32>
    %38 = arith.addf %35, %37 : vector<128x32xf32>
    %cst_36 = arith.constant 0.000000e+00 : f32
    %39 = vector.broadcast %cst_36 : f32 to vector<128x32xf32>
    %40 = arith.maximumf %38, %39 : vector<128x32xf32>
    %c0_37 = arith.constant 0 : index
    %c0_38 = arith.constant 0 : index
    %41 = vector.load %arg16[%c0_37, %c0_38] : memref<32x10xf32, #tpu.memory_space<vmem>>, vector<32x10xf32>
    %cst_39 = arith.constant dense<0.000000e+00> : vector<128x10xf32>
    %42 = tpu.matmul %40, %41, %cst_39 {dimension_numbers = #tpu.dot_dimension_numbers<[1], [0], [0], [1], [0, 0, 1, 1], [], []>} : vector<128x32xf32>, vector<32x10xf32>, vector<128x10xf32> -> vector<128x10xf32>
    %c0_40 = arith.constant 0 : index
    %c0_41 = arith.constant 0 : index
    %43 = vector.load %arg17[%c0_40, %c0_41] : memref<1x10xf32, #tpu.memory_space<vmem>>, vector<1x10xf32>
    %44 = vector.broadcast %43 : vector<1x10xf32> to vector<128x10xf32>
    %45 = arith.addf %42, %44 : vector<128x10xf32>
    %c0_42 = arith.constant 0 : index
    %c0_43 = arith.constant 0 : index
    %46 = vector.load %arg22[%c0_42, %c0_43] : memref<128x10xf32, #tpu.memory_space<vmem>>, vector<128x10xf32>
    tpu.vector_store %arg22[%c0_42, %c0_43], %45 {strides = array<i32>} : memref<128x10xf32, #tpu.memory_space<vmem>>, vector<128x10xf32>,
    %47 = tpu.iota {dimensions = array<i32: 1>} : vector<32x128xi32>
    %48 = tpu.iota {dimensions = array<i32: 0>} : vector<32x128xi32>
    %c4_i32 = arith.constant 4 : i32
    %49 = vector.broadcast %c4_i32 : i32 to vector<32x128xi32>
    %50 = arith.muli %48, %49 : vector<32x128xi32>
    %51 = arith.cmpi sge, %47, %50 : vector<32x128xi32>
    %c4_i32_44 = arith.constant 4 : i32
    %52 = vector.broadcast %c4_i32_44 : i32 to vector<32x128xi32>
    %53 = arith.addi %50, %52 : vector<32x128xi32>
    %54 = arith.cmpi slt, %47, %53 : vector<32x128xi32>
    %55 = arith.andi %51, %54 : vector<32x128xi1>
    %56 = arith.extui %55 : vector<32x128xi1> to vector<32x128xi32>
    %57 = arith.sitofp %56 : vector<32x128xi32> to vector<32x128xf32>
    %cst_45 = arith.constant dense<0.000000e+00> : vector<32x32xf32>
    %58 = tpu.matmul %57, %33, %cst_45 {dimension_numbers = #tpu.dot_dimension_numbers<[1], [0], [0], [1], [0, 0, 1, 1], [], []>} : vector<32x128xf32>, vector<128x32xf32>, vector<32x32xf32> -> vector<32x32xf32>
    %c0_46 = arith.constant 0 : index
    %c0_47 = arith.constant 0 : index
    %59 = vector.load %arg18[%c0_46, %c0_47] : memref<32x32xf32, #tpu.memory_space<vmem>>, vector<32x32xf32>
    %cst_48 = arith.constant dense<0.000000e+00> : vector<32x32xf32>
    %60 = tpu.matmul %58, %59, %cst_48 {dimension_numbers = #tpu.dot_dimension_numbers<[1], [0], [0], [1], [0, 0, 1, 1], [], []>} : vector<32x32xf32>, vector<32x32xf32>, vector<32x32xf32> -> vector<32x32xf32>
    %c0_49 = arith.constant 0 : index
    %c0_50 = arith.constant 0 : index
    %61 = vector.load %arg19[%c0_49, %c0_50] : memref<1x32xf32, #tpu.memory_space<vmem>>, vector<1x32xf32>
    %62 = vector.broadcast %61 : vector<1x32xf32> to vector<32x32xf32>
    %63 = arith.addf %60, %62 : vector<32x32xf32>
    %cst_51 = arith.constant 0.000000e+00 : f32
    %64 = vector.broadcast %cst_51 : f32 to vector<32x32xf32>
    %65 = arith.maximumf %63, %64 : vector<32x32xf32>
    %c0_52 = arith.constant 0 : index
    %c0_53 = arith.constant 0 : index
    %66 = vector.load %arg20[%c0_52, %c0_53] : memref<32x6xf32, #tpu.memory_space<vmem>>, vector<32x6xf32>
    %cst_54 = arith.constant dense<0.000000e+00> : vector<32x6xf32>
    %67 = tpu.matmul %65, %66, %cst_54 {dimension_numbers = #tpu.dot_dimension_numbers<[1], [0], [0], [1], [0, 0, 1, 1], [], []>} : vector<32x32xf32>, vector<32x6xf32>, vector<32x6xf32> -> vector<32x6xf32>
    %c0_55 = arith.constant 0 : index
    %c0_56 = arith.constant 0 : index
    %68 = vector.load %arg21[%c0_55, %c0_56] : memref<1x6xf32, #tpu.memory_space<vmem>>, vector<1x6xf32>
    %69 = vector.broadcast %68 : vector<1x6xf32> to vector<32x6xf32>
    %70 = arith.addf %67, %69 : vector<32x6xf32>
    %c0_57 = arith.constant 0 : index
    %c0_58 = arith.constant 0 : index
    %71 = vector.load %arg23[%c0_57, %c0_58] : memref<32x6xf32, #tpu.memory_space<vmem>>, vector<32x6xf32>
    tpu.vector_store %arg23[%c0_57, %c0_58], %70 {strides = array<i32>} : memref<32x6xf32, #tpu.memory_space<vmem>>, vector<32x6xf32>,
    return
  }
  func.func @transform_0(%arg0: i32) -> (i32, i32) {
    %c0_i32 = arith.constant 0 : i32
    %c0_i32_0 = arith.constant 0 : i32
    return %arg0, %c0_i32 : i32, i32
  }
  func.func @transform_1(%arg0: i32) -> (i32, i32) {
    %c0_i32 = arith.constant 0 : i32
    %c0_i32_0 = arith.constant 0 : i32
    return %arg0, %c0_i32 : i32, i32
  }
  func.func @transform_2(%arg0: i32) -> (i32, i32) {
    %c0_i32 = arith.constant 0 : i32
    %c0_i32_0 = arith.constant 0 : i32
    return %arg0, %c0_i32 : i32, i32
  }
  func.func @transform_3(%arg0: i32) -> (i32, i32) {
    %c0_i32 = arith.constant 0 : i32
    %c0_i32_0 = arith.constant 0 : i32
    return %arg0, %c0_i32 : i32, i32
  }
  func.func @transform_4(%arg0: i32) -> (i32, i32) {
    %c0_i32 = arith.constant 0 : i32
    %c0_i32_0 = arith.constant 0 : i32
    %c0_i32_1 = arith.constant 0 : i32
    return %c0_i32, %c0_i32_0 : i32, i32
  }
  func.func @transform_5(%arg0: i32) -> (i32, i32) {
    %c0_i32 = arith.constant 0 : i32
    %c0_i32_0 = arith.constant 0 : i32
    %c0_i32_1 = arith.constant 0 : i32
    return %c0_i32, %c0_i32_0 : i32, i32
  }
  func.func @transform_6(%arg0: i32) -> (i32, i32) {
    %c0_i32 = arith.constant 0 : i32
    %c0_i32_0 = arith.constant 0 : i32
    %c0_i32_1 = arith.constant 0 : i32
    return %c0_i32, %c0_i32_0 : i32, i32
  }
  func.func @transform_7(%arg0: i32) -> (i32, i32) {
    %c0_i32 = arith.constant 0 : i32
    %c0_i32_0 = arith.constant 0 : i32
    %c0_i32_1 = arith.constant 0 : i32
    return %c0_i32, %c0_i32_0 : i32, i32
  }
  func.func @transform_8(%arg0: i32) -> (i32, i32) {
    %c0_i32 = arith.constant 0 : i32
    %c0_i32_0 = arith.constant 0 : i32
    %c0_i32_1 = arith.constant 0 : i32
    return %c0_i32, %c0_i32_0 : i32, i32
  }
  func.func @transform_9(%arg0: i32) -> (i32, i32) {
    %c0_i32 = arith.constant 0 : i32
    %c0_i32_0 = arith.constant 0 : i32
    %c0_i32_1 = arith.constant 0 : i32
    return %c0_i32, %c0_i32_0 : i32, i32
  }
  func.func @transform_10(%arg0: i32) -> (i32, i32) {
    %c0_i32 = arith.constant 0 : i32
    %c0_i32_0 = arith.constant 0 : i32
    %c0_i32_1 = arith.constant 0 : i32
    return %c0_i32, %c0_i32_0 : i32, i32
  }
  func.func @transform_11(%arg0: i32) -> (i32, i32) {
    %c0_i32 = arith.constant 0 : i32
    %c0_i32_0 = arith.constant 0 : i32
    %c0_i32_1 = arith.constant 0 : i32
    return %c0_i32, %c0_i32_0 : i32, i32
  }
  func.func @transform_12(%arg0: i32) -> (i32, i32) {
    %c0_i32 = arith.constant 0 : i32
    %c0_i32_0 = arith.constant 0 : i32
    %c0_i32_1 = arith.constant 0 : i32
    return %c0_i32, %c0_i32_0 : i32, i32
  }
  func.func @transform_13(%arg0: i32) -> (i32, i32) {
    %c0_i32 = arith.constant 0 : i32
    %c0_i32_0 = arith.constant 0 : i32
    %c0_i32_1 = arith.constant 0 : i32
    return %c0_i32, %c0_i32_0 : i32, i32
  }
  func.func @transform_14(%arg0: i32) -> (i32, i32) {
    %c0_i32 = arith.constant 0 : i32
    %c0_i32_0 = arith.constant 0 : i32
    %c0_i32_1 = arith.constant 0 : i32
    return %c0_i32, %c0_i32_0 : i32, i32
  }
  func.func @transform_15(%arg0: i32) -> (i32, i32) {
    %c0_i32 = arith.constant 0 : i32
    %c0_i32_0 = arith.constant 0 : i32
    %c0_i32_1 = arith.constant 0 : i32
    return %c0_i32, %c0_i32_0 : i32, i32
  }
  func.func @transform_16(%arg0: i32) -> (i32, i32) {
    %c0_i32 = arith.constant 0 : i32
    %c0_i32_0 = arith.constant 0 : i32
    %c0_i32_1 = arith.constant 0 : i32
    return %c0_i32, %c0_i32_0 : i32, i32
  }
  func.func @transform_17(%arg0: i32) -> (i32, i32) {
    %c0_i32 = arith.constant 0 : i32
    %c0_i32_0 = arith.constant 0 : i32
    %c0_i32_1 = arith.constant 0 : i32
    return %c0_i32, %c0_i32_0 : i32, i32
  }
  func.func @transform_18(%arg0: i32) -> (i32, i32) {
    %c0_i32 = arith.constant 0 : i32
    %c0_i32_0 = arith.constant 0 : i32
    %c0_i32_1 = arith.constant 0 : i32
    return %c0_i32, %c0_i32_0 : i32, i32
  }
  func.func @transform_19(%arg0: i32) -> (i32, i32) {
    %c0_i32 = arith.constant 0 : i32
    %c0_i32_0 = arith.constant 0 : i32
    %c0_i32_1 = arith.constant 0 : i32
    return %c0_i32, %c0_i32_0 : i32, i32
  }
  func.func @transform_20(%arg0: i32) -> (i32, i32) {
    %c0_i32 = arith.constant 0 : i32
    %c0_i32_0 = arith.constant 0 : i32
    %c0_i32_1 = arith.constant 0 : i32
    return %c0_i32, %c0_i32_0 : i32, i32
  }
  func.func @transform_21(%arg0: i32) -> (i32, i32) {
    %c0_i32 = arith.constant 0 : i32
    %c0_i32_0 = arith.constant 0 : i32
    return %arg0, %c0_i32 : i32, i32
  }
  func.func @transform_22(%arg0: i32) -> (i32, i32) {
    %c0_i32 = arith.constant 0 : i32
    %c0_i32_0 = arith.constant 0 : i32
    return %arg0, %c0_i32 : i32, i32
  }
}

</mosaic_0001>

<bundles_post_ra>
// kernel: state_decoder_forward.1
= control target key start
LH: loop header
LB: loop body
LE: loop exit
PB: predicated region body
PF: predicated region fallthrough
CT: control target
= control target key end

     0   :  { %s4140_s0 = inlined_call_operand.vmem [shape: f32[256,8], index: 0, kind: input, shape index: {}]   ;;  %s4141_s1 = inlined_call_operand.vmem [shape: f32[256,8], index: 1, kind: input, shape index: {}]   ;;  %s4142_s2 = inlined_call_operand.vmem [shape: f32[256,1], index: 2, kind: input, shape index: {}]   ;;  %s4143_s3 = inlined_call_operand.vmem [shape: f32[256,4], index: 3, kind: input, shape index: {}]   ;;  %s4144_s4 = inlined_call_operand.vmem [shape: f32[8,32], index: 4, kind: input, shape index: {}]   ;;  %s4145_s5 = inlined_call_operand.vmem [shape: f32[8,32], index: 5, kind: input, shape index: {}]   ;;  %s4146_s6 = inlined_call_operand.vmem [shape: f32[1,32], index: 6, kind: input, shape index: {}]   ;;  %s4147_s7 = inlined_call_operand.vmem [shape: f32[4,32], index: 7, kind: input, shape index: {}]   ;;  %s4148_s8 = inlined_call_operand.vmem [shape: f32[1,32], index: 8, kind: input, shape index: {}]   ;;  %s4149_s9 = inlined_call_operand.vmem [shape: f32[32,32], index: 9, kind: input, shape index: {}]   ;;  %s4150_s10 = inlined_call_operand.vmem [shape: f32[1,32], index: 10, kind: input, shape index: {}]   ;;  %s4151_s11 = inlined_call_operand.vmem [shape: f32[32,32], index: 11, kind: input, shape index: {}]   ;;  %s4152_s12 = inlined_call_operand.vmem [shape: f32[1,32], index: 12, kind: input, shape index: {}]   ;;  %s4153_s13 = inlined_call_operand.vmem [shape: f32[32,32], index: 13, kind: input, shape index: {}]   ;;  %s4154_s14 = inlined_call_operand.vmem [shape: f32[1,32], index: 14, kind: input, shape index: {}]   ;;  %s4155_s15 = inlined_call_operand.vmem [shape: f32[32,10], index: 15, kind: input, shape index: {}]   ;;  %s4156_s16 = inlined_call_operand.vmem [shape: f32[1,10], index: 16, kind: input, shape index: {}]   ;;  %s4157_s17 = inlined_call_operand.vmem [shape: f32[32,32], index: 17, kind: input, shape index: {}]   ;;  %s4158_s18 = inlined_call_operand.vmem [shape: f32[1,32], index: 18, kind: input, shape index: {}]   ;;  %s4159_s19 = inlined_call_operand.vmem [shape: f32[32,6], index: 19, kind: input, shape index: {}]   ;;  %s4160_s20 = inlined_call_operand.vmem [shape: f32[1,6], index: 20, kind: input, shape index: {}]   ;;  %s4161_s21 = inlined_call_operand.vmem [shape: f32[256,10], index: 21, kind: output, shape index: {0}]   ;;  %s4162_s22 = inlined_call_operand.vmem [shape: f32[64,6], index: 22, kind: output, shape index: {1}]  }
   0x1   :  { %4163 = sst [smem:[#allocation2_spill]] %s4140_s0 }
   0x2   :  { %4164 = sst [smem:[#allocation3_spill]] %s4141_s1 }
   0x3   :  { %4165 = sst [smem:[#allocation4_spill]] %s4142_s2 }
   0x4   :  { %4166 = sst [smem:[#allocation5_spill]] %s4143_s3  ;;  %s3664_s3 = smov 0  }
   0x5   :  { %4167 = sst [smem:[#allocation6_spill]] %s4144_s4 }
   0x6   :  { %4168 = sst [smem:[#allocation7_spill]] %s4145_s5 }
   0x7   :  { %4169 = sst [smem:[#allocation8_spill]] %s4146_s6 }
   0x8 LB: > { %s2930_s28 = sadd.s32 4294967295, %s3545_s3   ;;  %p2934_p0 = scmp.ge.s32.totalorder %s3545_s3, 1  ;;  %s3545_s3 = sphi %s3664_s3, %s33_s3  }
   0x9   : > { %p649_p1 = scmp.lt.s32.totalorder %s3545_s3, 3 }
   0xb   : > { %p650_p2 = pnand %p2934_p0, %p649_p1 }
   0xc   : > { %s4170_s4 = sld [smem:[#allocation7_spill]] (!%p650_p2)  ;;  %s2935_s0 = sshll.u32 (!%p650_p2), %s2930_s28, 4 }
   0xd   : > { %653 = sbr.rel (%p650_p2) target bundleno = 1310 (0x51e), region = 104  ;;  %p732_p3 = scmp.lt.s32.totalorder (!%p650_p2), %s2935_s0, 31 }
   0xe   : > { %s4171_s6 = sld [smem:[#allocation6_spill]] (!%p650_p2)  ;;  %s2945_s5 = sshll.u32 (!%p650_p2), %s2930_s28, 2 }
   0xf   : > { %s4172_s27 = sld [smem:[#allocation3_spill]] (!%p650_p2)  ;;  %p762_p4 = scmp.lt.s32.totalorder (!%p650_p2), %s2945_s5, 7 }
  0x10   : > { %s4173_s23 = sld [smem:[#allocation2_spill]] (!%p650_p2) }
  0x11   : > { %s4174_s24 = sld [smem:[#allocation4_spill]] (!%p650_p2) }
  0x12   : > { %v800_v0 = vld [vmem:[%s4170_s4] sm:$0xff]  ;;  %vm1254_vm0 = vcmask 1043456   ;;  %s4178_s0 = smov (!%p732_p3, %s2935_s0), 31  ;;  %v3547_v3 = vmov 0   ;;  %vm801_vm1 = vcmask 64512   ;;  %vm1205_vm2 = vcmask 31744  }
  0x13   : > { %v1204_v1 = vld [vmem:[%s4147_s7] sm:$0xf]  ;;  %3253 = vmatprep.subr.mxu0 %v800_v0  ;;  %3525 = vmatprep.subr.mxu1 %v800_v0  ;;  %s3684_s25 = sshll.u32 %s4178_s0, 3  ;;  %s4176_s0 = sld [smem:[#allocation8_spill]]  ;;  %vm1604_vm3 = vcmask 261120  }
  0x14   : > { %v783_v2 = vld [vmem:[%s4171_s6] sm:$0xff]  ;;  %3254 = vmatpush3.msra.mxu0 %v800_v0  ;;  %3526 = vmatpush3.msra.mxu1 %v800_v0  ;;  %s4180_s5 = smov (!%p762_p4, %s2945_s5), 7 }
  0x15   : > { %3305 = vmatprep.subr.msk.mxu0 %vm1254_vm0, %v1204_v1  ;;  %3279 = vmatprep.subr.mxu1 %v783_v2  ;;  %s3690_s29 = scalar_lea.vmem %s4172_s27, %s3684_s25  ;;  %s4175_s27 = sld [smem:[#allocation5_spill]] }
  0x16   : > { %3537 = vset.pattern.permute.xlu0 %v3547_v3  ;;  %3538 = vset.pattern.permute.xlu1 %v3547_v3  ;;  %s3696_s1 = scalar_lea.vmem %s4173_s23, %s3684_s25  ;;  %v784_v4 = vld [vmem:[%s3690_s29] sm:$0xff]  ;;  %v798_v5 = vld [vmem:[%s3690_s29 + $0x70] sm:$0xff]  ;;  %v785_v6 = vld [vmem:[%s3690_s29 + $0x8] sm:$0xff] }
  0x17   : > { %3255 = vmatprep.mubr.msk.f32.mxu0 %vm801_vm1, %v784_v4  ;;  %3276 = vmatprep.mubr.msk.f32.mxu1 %vm801_vm1, %v798_v5  ;;  %v799_v7 = vld [vmem:[%s3690_s29 + $0x78] sm:$0xff]  ;;  %v786_v8 = vld [vmem:[%s3690_s29 + $0x10] sm:$0xff]  ;;  %v767_v9 = vld [vmem:[%s3696_s1] sm:$0xff]  ;;  %s3735_s6 = scalar_lea.vmem %s4174_s24, %s3684_s25  ;;  %s2946_s24 = sshll.u32 %s4180_s5, 3 }
  0x18   : > { %3256 = vmatmul.mubr.msk.f32.vlgmr.msra.gmra.mxu0 %vm801_vm1, %v785_v6  ;;  %3277 = vmatmul.mubr.msk.f32.vlgmr.msra.gmra.mxu1 %vm801_vm1, %v799_v7  ;;  %v787_v10 = vld [vmem:[%s3690_s29 + $0x18] sm:$0xff]  ;;  %v768_v11 = vld [vmem:[%s3696_s1 + $0x8] sm:$0xff]  ;;  %v788_v12 = vld [vmem:[%s3690_s29 + $0x20] sm:$0xff] }
  0x19   : > { %3306 = vmatpush3.msk.msra.mxu0 %vm1254_vm0, %v1204_v1  ;;  %3258 = vmatprep.mubr.msk.f32.mxu0 %vm801_vm1, %v786_v8  ;;  %v769_v13 = vld [vmem:[%s3696_s1 + $0x10] sm:$0xff]  ;;  %v789_v14 = vld [vmem:[%s3690_s29 + $0x28] sm:$0xff]  ;;  %v770_v15 = vld [vmem:[%s3696_s1 + $0x18] sm:$0xff]  ;;  %vm2442_vm0 = vcmask 80896  }
  0x1a   : > { %3280 = vmatpush3.msra.mxu1 %v783_v2  ;;  %3281 = vmatprep.mubr.msk.f32.mxu1 %vm801_vm1, %v767_v9  ;;  %v790_v16 = vld [vmem:[%s3690_s29 + $0x30] sm:$0xff]  ;;  %v771_v17 = vld [vmem:[%s3696_s1 + $0x20] sm:$0xff]  ;;  %v791_v18 = vld [vmem:[%s3690_s29 + $0x38] sm:$0xff] }
  0x1b   : > { %v772_v19 = vld [vmem:[%s3696_s1 + $0x28] sm:$0xff]  ;;  %v792_v20 = vld [vmem:[%s3690_s29 + $0x40] sm:$0xff]  ;;  %v773_v21 = vld [vmem:[%s3696_s1 + $0x30] sm:$0xff]  ;;  %s3761_s30 = scalar_lea.vmem %s4175_s27, %s3684_s25 }
  0x1c   : > { %3259 = vmatmul.mubr.msk.f32.gmra.mxu0 %vm801_vm1, %v787_v10  ;;  %3282 = vmatmul.mubr.msk.f32.vlgmr.msra.gmra.mxu1 %vm801_vm1, %v768_v11  ;;  %v793_v22 = vld [vmem:[%s3690_s29 + $0x48] sm:$0xff]  ;;  %v774_v23 = vld [vmem:[%s3696_s1 + $0x38] sm:$0xff]  ;;  %v794_v24 = vld [vmem:[%s3690_s29 + $0x50] sm:$0xff] }
  0x1d   : > { %3261 = vmatprep.mubr.msk.f32.mxu0 %vm801_vm1, %v788_v12  ;;  %3284 = vmatprep.mubr.msk.f32.mxu1 %vm801_vm1, %v769_v13  ;;  %v775_v25 = vld [vmem:[%s3696_s1 + $0x40] sm:$0xff]  ;;  %v1421_v27 = vld [vmem:[%s3735_s6 + $0x10] sm:$0xff]  ;;  %v1420_v28 = vld [vmem:[%s3735_s6 + $0x8] sm:$0xff] }
  0x1e   : > { %v1419_v26 = vld [vmem:[%s3735_s6] sm:$0xff]  ;;  %1448 = vperm.xlu1 %3538, %v1421_v27   ;;  %v1422_v29 = vld [vmem:[%s3735_s6 + $0x18] sm:$0xff]  ;;  %v776_v31 = vld [vmem:[%s3696_s1 + $0x48] sm:$0xff] }
  0x1f   : > { %1438 = vperm.xlu0 %3537, %v1419_v26   ;;  %v795_v30 = vld [vmem:[%s3690_s29 + $0x58] sm:$0xff]  ;;  %v796_v32 = vld [vmem:[%s3690_s29 + $0x60] sm:$0xff]  ;;  %v777_v33 = vld [vmem:[%s3696_s1 + $0x50] sm:$0xff] }
  0x20   : > { %3262 = vmatmul.mubr.msk.f32.gmra.mxu0 %vm801_vm1, %v789_v14  ;;  %3285 = vmatmul.mubr.msk.f32.gmra.mxu1 %vm801_vm1, %v770_v15  ;;  %v1423_v34 = vld [vmem:[%s3735_s6 + $0x20] sm:$0xff]  ;;  %v1424_v35 = vld [vmem:[%s3735_s6 + $0x28] sm:$0xff]  ;;  %v778_v37 = vld [vmem:[%s3696_s1 + $0x58] sm:$0xff] }
  0x21   : > { %3264 = vmatprep.mubr.msk.f32.mxu0 %vm801_vm1, %v790_v16  ;;  %3287 = vmatprep.mubr.msk.f32.mxu1 %vm801_vm1, %v771_v17  ;;  %v797_v36 = vld [vmem:[%s3690_s29 + $0x68] sm:$0xff]  ;;  %v779_v38 = vld [vmem:[%s3696_s1 + $0x60] sm:$0xff]  ;;  %v1425_v40 = vld [vmem:[%s3735_s6 + $0x30] sm:$0xff] }
  0x22   : > { %1453 = vperm.xlu1 %3538, %v1422_v29   ;;  %v1188_v39 = vld [vmem:[%s3761_s30] sm:$0xff]  ;;  %v1426_v41 = vld [vmem:[%s3735_s6 + $0x38] sm:$0xff]  ;;  %v780_v42 = vld [vmem:[%s3696_s1 + $0x68] sm:$0xff] }
  0x23   : > { %1443 = vperm.xlu0 %3537, %v1420_v28   ;;  %v1189_v43 = vld [vmem:[%s3761_s30 + $0x8] sm:$0xff]  ;;  %v781_v44 = vld [vmem:[%s3696_s1 + $0x70] sm:$0xff]  ;;  %v1427_v46 = vld [vmem:[%s3735_s6 + $0x40] sm:$0xff] }
  0x24   : > { %3265 = vmatmul.mubr.msk.f32.gmra.mxu0 %vm801_vm1, %v791_v18  ;;  %3288 = vmatmul.mubr.msk.f32.gmra.mxu1 %vm801_vm1, %v772_v19  ;;  %v1190_v45 = vld [vmem:[%s3761_s30 + $0x10] sm:$0xff]  ;;  %v1428_v47 = vld [vmem:[%s3735_s6 + $0x48] sm:$0xff]  ;;  %v782_v48 = vld [vmem:[%s3696_s1 + $0x78] sm:$0xff]  ;;  %s4088_s1 = scalar_lea.vmem %s4161_s21, %s3684_s25 }
  0x25   : > { %3267 = vmatprep.mubr.msk.f32.mxu0 %vm801_vm1, %v792_v20  ;;  %3290 = vmatprep.mubr.msk.f32.mxu1 %vm801_vm1, %v773_v21  ;;  %v1191_v49 = vld [vmem:[%s3761_s30 + $0x18] sm:$0xff]  ;;  %v1192_v50 = vld [vmem:[%s3761_s30 + $0x20] sm:$0xff]  ;;  %v1429_v51 = vld [vmem:[%s3735_s6 + $0x50] sm:$0xff] }
  0x26   : > { %1463 = vperm.xlu1 %3538, %v1424_v35   ;;  %v1430_v52 = vld [vmem:[%s3735_s6 + $0x58] sm:$0xff]  ;;  %v1193_v53 = vld [vmem:[%s3761_s30 + $0x28] sm:$0xff]  ;;  %v1194_v54 = vld [vmem:[%s3761_s30 + $0x30] sm:$0xff] }
  0x27   : > { %1458 = vperm.xlu0 %3537, %v1423_v34   ;;  %v1431_v55 = vld [vmem:[%s3735_s6 + $0x60] sm:$0xff]  ;;  %v1432_v56 = vld [vmem:[%s3735_s6 + $0x68] sm:$0xff]  ;;  %v1195_v57 = vld [vmem:[%s3761_s30 + $0x38] sm:$0xff] }
  0x28   : > { %3268 = vmatmul.mubr.msk.f32.gmra.mxu0 %vm801_vm1, %v793_v22  ;;  %3291 = vmatmul.mubr.msk.f32.gmra.mxu1 %vm801_vm1, %v774_v23  ;;  %v1196_v58 = vld [vmem:[%s3761_s30 + $0x40] sm:$0xff]  ;;  %v1433_v59 = vld [vmem:[%s3735_s6 + $0x70] sm:$0xff]  ;;  %v1434_v60 = vld [vmem:[%s3735_s6 + $0x78] sm:$0xff] }
  0x29   : > { %3270 = vmatprep.mubr.msk.f32.mxu0 %vm801_vm1, %v794_v24  ;;  %3293 = vmatprep.mubr.msk.f32.mxu1 %vm801_vm1, %v775_v25  ;;  %v1197_v61 = vld [vmem:[%s3761_s30 + $0x48] sm:$0xff]  ;;  %v1198_v62 = vld [vmem:[%s3761_s30 + $0x50] sm:$0xff]  ;;  %v1199_v63 = vld [vmem:[%s3761_s30 + $0x58] sm:$0xff] }
  0x2a   : > { %1473 = vperm.xlu1 %3538, %v1426_v41   ;;  %v1200_v0 = vld [vmem:[%s3761_s30 + $0x60] sm:$0xff]  ;;  %v1201_v1 = vld [vmem:[%s3761_s30 + $0x68] sm:$0xff]  ;;  %v1202_v2 = vld [vmem:[%s3761_s30 + $0x70] sm:$0xff] }
  0x2b   : > { %1468 = vperm.xlu0 %3537, %v1425_v40   ;;  %v1203_v3 = vld [vmem:[%s3761_s30 + $0x78] sm:$0xff]  ;;  %v1595_v5 = vld [vmem:[%s4149_s9 + $0x10] sm:$0xff]  ;;  %v1594_v6 = vld [vmem:[%s4149_s9 + $0x8] sm:$0xff]  ;;  %s765_s30 = scalar_lea.vmem %s4162_s22, %s2946_s24 }
  0x2c   : > { %3271 = vmatmul.mubr.msk.f32.gmra.mxu0 %vm801_vm1, %v795_v30  ;;  %3294 = vmatmul.mubr.msk.f32.gmra.mxu1 %vm801_vm1, %v776_v31  ;;  %v1596_v4 = vld [vmem:[%s4149_s9 + $0x18] sm:$0xff]  ;;  %v1593_v7 = vld [vmem:[%s4149_s9] sm:$0xff]  ;;  %v1816_v9 = vld [vmem:[%s4151_s11 + $0x10] sm:$0xff] }
  0x2d   : > { %3273 = vmatprep.mubr.msk.f32.mxu0 %vm801_vm1, %v796_v32  ;;  %3296 = vmatprep.mubr.msk.f32.mxu1 %vm801_vm1, %v777_v33  ;;  %v1817_v8 = vld [vmem:[%s4151_s11 + $0x18] sm:$0xff]  ;;  %v1815_v10 = vld [vmem:[%s4151_s11 + $0x8] sm:$0xff] }
  0x2e   : > { %1483 = vperm.xlu1 %3538, %v1428_v47   ;;  %3331 = vmatprep.subr.mxu1 %v1596_v4 }
  0x2f   : > { %1478 = vperm.xlu0 %3537, %v1427_v46   ;;  %3332 = vmatpush3.msra.mxu1 %v1596_v4 }
  0x30   : > { %3274 = vmatmul.mubr.msk.f32.gmra.mxu0 %vm801_vm1, %v797_v36  ;;  %3297 = vmatmul.mubr.msk.f32.gmra.mxu1 %vm801_vm1, %v778_v37 }
  0x31   : > { %3299 = vmatprep.mubr.msk.f32.mxu1 %vm801_vm1, %v779_v38  ;;  %3307 = vmatprep.mubr.msk.f32.mxu0 %vm1205_vm2, %v1188_v39  ;;  %v3861_v38 = vld [vmem:[%s4176_s0] ss:$0 sm:$0xff] }
  0x32   : > { %1493 = vperm.xlu1 %3538, %v1430_v52   ;;  %3333 = vmatprep.subr.mxu1 %v1595_v5 }
  0x33   : > { %1488 = vperm.xlu0 %3537, %v1429_v51   ;;  %3334 = vmatpush3.msra.mxu1 %v1595_v5 }
  0x34   : > { %3300 = vmatmul.mubr.msk.f32.gmra.mxu1 %vm801_vm1, %v780_v42  ;;  %3308 = vmatmul.mubr.msk.f32.vlgmr.msra.gmra.mxu0 %vm1205_vm2, %v1189_v43 }
  0x35   : > { %3302 = vmatprep.mubr.msk.f32.mxu1 %vm801_vm1, %v781_v44  ;;  %3310 = vmatprep.mubr.msk.f32.mxu0 %vm1205_vm2, %v1190_v45 }
  0x36   : > { %1503 = vperm.xlu1 %3538, %v1432_v56   ;;  %3335 = vmatprep.subr.mxu1 %v1594_v6  ;;  %v3873_v56 = vld [vmem:[%s4148_s8] ss:$0 sm:$0xff] }
  0x37   : > { %1498 = vperm.xlu0 %3537, %v1431_v55   ;;  %3336 = vmatpush3.msra.mxu1 %v1594_v6 }
  0x38   : > { %3303 = vmatmul.mubr.msk.f32.gmra.mxu1 %vm801_vm1, %v782_v48  ;;  %3311 = vmatmul.mubr.msk.f32.gmra.mxu0 %vm1205_vm2, %v1191_v49  ;;  %vm2799_vm1 = vcmask 48128  }
  0x39   : > { %3313 = vmatprep.mubr.msk.f32.mxu0 %vm1205_vm2, %v1192_v50  ;;  %3337 = vmatprep.subr.mxu1 %v1593_v7 }
  0x3a   : > { %1513 = vperm.xlu1 %3538, %v1434_v60   ;;  %3338 = vmatpush3.msra.mxu1 %v1593_v7 }
  0x3b   : > { %1508 = vperm.xlu0 %3537, %v1433_v59   ;;  %3363 = vmatprep.subr.mxu0 %v1817_v8 }
  0x3c   : > { %3314 = vmatmul.mubr.msk.f32.gmra.mxu0 %vm1205_vm2, %v1193_v53 }
  0x3d   : > { %3316 = vmatprep.mubr.msk.f32.mxu0 %vm1205_vm2, %v1194_v54  ;;  %3364 = vmatpush3.msra.mxu0 %v1817_v8 }
  0x3e   : > { %3365 = vmatprep.subr.mxu0 %v1816_v9 }
  0x3f   : > { %3366 = vmatpush3.msra.mxu0 %v1816_v9 }
  0x40   : > { %3317 = vmatmul.mubr.msk.f32.gmra.mxu0 %vm1205_vm2, %v1195_v57  ;;  %3367 = vmatprep.subr.mxu0 %v1815_v10 }
  0x41   : > { %3319 = vmatprep.mubr.msk.f32.mxu0 %vm1205_vm2, %v1196_v58  ;;  %3368 = vmatpush3.msra.mxu0 %v1815_v10 }
  0x44   : > { %3320 = vmatmul.mubr.msk.f32.gmra.mxu0 %vm1205_vm2, %v1197_v61 }
  0x45   : > { %3322 = vmatprep.mubr.msk.f32.mxu0 %vm1205_vm2, %v1198_v62 }
  0x48   : > { %3323 = vmatmul.mubr.msk.f32.gmra.mxu0 %vm1205_vm2, %v1199_v63 }
  0x49   : > { %3325 = vmatprep.mubr.msk.f32.mxu0 %vm1205_vm2, %v1200_v0 }
  0x4c   : > { %3326 = vmatmul.mubr.msk.f32.gmra.mxu0 %vm1205_vm2, %v1201_v1 }
  0x4d   : > { %3328 = vmatprep.mubr.msk.f32.mxu0 %vm1205_vm2, %v1202_v2 }
  0x50   : > { %3329 = vmatmul.mubr.msk.f32.gmra.mxu0 %vm1205_vm2, %v1203_v3 }
  0x99   : > { %v1449_v23 = vpop.permute.xlu1 %1448 }
  0x9a   : > { %v1439_v26 = vpop.permute.xlu0 %1438  ;;  %v1524_v5 = vmul.f32 %v3861_v38, %v1449_v23 }
  0x9b   : > { %v1522_v49 = vmul.f32 %v3861_v38, %v1439_v26 }
  0x9d   : > { %v1454_v30 = vpop.permute.xlu1 %1453 }
  0x9e   : > { %v1444_v33 = vpop.permute.xlu0 %1443  ;;  %v1525_v52 = vmul.f32 %v3861_v38, %v1454_v30 }
  0x9f   : > { %v1523_v43 = vmul.f32 %v3861_v38, %v1444_v33 }
  0xa1   : > { %v1464_v37 = vpop.permute.xlu1 %1463 }
  0xa2   : > { %v1459_v40 = vpop.permute.xlu0 %1458  ;;  %v1527_v8 = vmul.f32 %v3861_v38, %v1464_v37 }
  0xa5   : > { %v1474_v47 = vpop.permute.xlu1 %1473 }
  0xa6   : > { %v1469_v54 = vpop.permute.xlu0 %1468 }
  0xa9   : > { %v1484_v2 = vpop.permute.xlu1 %1483 }
  0xaa   : > { %v1479_v10 = vpop.permute.xlu0 %1478 }
  0xad   : > { %v1494_v33 = vpop.permute.xlu1 %1493 }
  0xd8   : > { %v3257_v11 = vpop.f32.mrf.mxu0  ;;  %v3844_v12 = vpop.f32.mrf.mxu1 }
  0xda   : > { %v916_v13 = vpop.f32.mrf.mxu0  ;;  %v3846_v14 = vpop.f32.mrf.mxu1 }
  0xdc   : > { %v3260_v15 = vpop.f32.mrf.mxu0  ;;  %v3283_v16 = vpop.f32.mrf.mxu1 }
  0xdd   : > { %v1115_v44 = vadd.f32 %v3283_v16, %v3257_v11 }
  0xde   : > { %v926_v17 = vpop.f32.mrf.mxu0  ;;  %v1109_v18 = vpop.f32.mrf.mxu1 }
  0xdf   : > { %v1110_v46 = vadd.f32 %v1109_v18, %v916_v13 }
  0xe0   : > { %v3263_v19 = vpop.f32.mrf.mxu0  ;;  %v3286_v20 = vpop.f32.mrf.mxu1 }
  0xe1   : > { %v1125_v53 = vadd.f32 %v3286_v20, %v3260_v15  ;;  %v1526_v20 = vmul.f32 %v3861_v38, %v1459_v40 }
  0xe2   : > { %v936_v21 = vpop.f32.mrf.mxu0  ;;  %v1119_v22 = vpop.f32.mrf.mxu1 }
  0xe3   : > { %v1120_v61 = vadd.f32 %v1119_v22, %v926_v17 }
  0xe4   : > { %v3266_v24 = vpop.f32.mrf.mxu0  ;;  %v3289_v25 = vpop.f32.mrf.mxu1 }
  0xe5   : > { %v1135_v1 = vadd.f32 %v3289_v25, %v3263_v19 }
  0xe6   : > { %v3848_v27 = vpop.f32.mrf.mxu0  ;;  %v1129_v28 = vpop.f32.mrf.mxu1 }
  0xe7   : > { %v1130_v9 = vadd.f32 %v1129_v28, %v936_v21  ;;  %v1529_v21 = vmul.f32 %v3861_v38, %v1474_v47 }
  0xe8   : > { %v3850_v29 = vpop.f32.mrf.mxu0  ;;  %v3292_v31 = vpop.f32.mrf.mxu1 }
  0xe9   : > { %v1145_v22 = vadd.f32 %v3292_v31, %v3266_v24 }
  0xea   : > { %v3852_v32 = vpop.f32.mrf.mxu0  ;;  %v1139_v35 = vpop.f32.mrf.mxu1 }
  0xeb   : > { %v1140_v28 = vadd.f32 %v1139_v35, %v3848_v27  ;;  %v1531_v27 = vmul.f32 %v3861_v38, %v1484_v2 }
  0xec   : > { %v3854_v34 = vpop.f32.mrf.mxu0  ;;  %v3295_v41 = vpop.f32.mrf.mxu1 }
  0xed   : > { %v1155_v24 = vadd.f32 %v3295_v41, %v3850_v29 }
  0xee   : > { %v3856_v36 = vpop.f32.mrf.mxu0  ;;  %v1149_v50 = vpop.f32.mrf.mxu1 }
  0xf0   : > { %v3863_v39 = vpop.f32.mrf.mxu0  ;;  %v3298_v62 = vpop.f32.mrf.mxu1 }
  0xf2   : > { %v3865_v42 = vpop.f32.mrf.mxu0  ;;  %v1159_v15 = vpop.f32.mrf.mxu1 }
  0xf4   : > { %v3309_v45 = vpop.f32.mrf.mxu0  ;;  %v3301_v31 = vpop.f32.mrf.mxu1 }
  0xf5   : > { %v1404_v48 = vadd.f32 %v3309_v45, %v1115_v44  ;;  %v1528_v44 = vmul.f32 %v3861_v38, %v1469_v54 }
  0xf6   : > { %v1324_v51 = vpop.f32.mrf.mxu0 }
  0xf7   : > { %v1539_v55 = vadd.f32 %v1523_v43, %v1404_v48  ;;  %v1403_v57 = vadd.f32 %v1324_v51, %v1110_v46  ;;  %v1489_v48 = vpop.permute.xlu0 %1488 }
  0xf8   : > { %v3312_v58 = vpop.f32.mrf.mxu0 }
  0xf9   : > { %v1538_v59 = vadd.f32 %v1522_v49, %v1403_v57  ;;  %v1406_v60 = vadd.f32 %v3312_v58, %v1125_v53  ;;  %v1562_v63 = vadd.f32 %v3873_v56, %v1539_v55  ;;  %v1150_v53 = vadd.f32 %v1149_v50, %v3852_v32  ;;  %v1169_v58 = vpop.f32.mrf.mxu1 }
  0xfa   : > { %v1334_v0 = vpop.f32.mrf.mxu0  ;;  %v1530_v55 = vmul.f32 %v3861_v38, %v1479_v10  ;;  %v1165_v57 = vadd.f32 %v3298_v62, %v3854_v34  ;;  %v1533_v32 = vmul.f32 %v3861_v38, %v1494_v33 }
  0xfb   : > { %v1561_v3 = vadd.f32 %v3873_v56, %v1538_v59  ;;  %v1541_v4 = vadd.f32 %v1525_v52, %v1406_v60  ;;  %v1405_v6 = vadd.f32 %v1334_v0, %v1120_v61  ;;  %v1578_v16 = vmax.f32 %v1562_v63, 0.0  ;;  %v1504_v61 = vpop.permute.xlu1 %1503 }
  0xfc   : > { %v3315_v7 = vpop.f32.mrf.mxu0 }
  0xfd   : > { %v1577_v11 = vmax.f32 %v1561_v3, 0.0  ;;  %v1408_v13 = vadd.f32 %v3315_v7, %v1135_v1  ;;  %v1564_v17 = vadd.f32 %v3873_v56, %v1541_v4  ;;  %v1540_v18 = vadd.f32 %v1524_v5, %v1405_v6  ;;  %v1499_v3 = vpop.permute.xlu0 %1498 }
  0xfe   : > { %v1344_v19 = vpop.f32.mrf.mxu0  ;;  %v1160_v4 = vadd.f32 %v1159_v15, %v3856_v36  ;;  %v1532_v6 = vmul.f32 %v3861_v38, %v1489_v48  ;;  %v1175_v7 = vadd.f32 %v3301_v31, %v3863_v39  ;;  %v1535_v36 = vmul.f32 %v3861_v38, %v1504_v61 }
  0xff   : > { %v1543_v25 = vadd.f32 %v1527_v8, %v1408_v13  ;;  %v1407_v23 = vadd.f32 %v1344_v19, %v1130_v9  ;;  %3339 = vmatprep.mubr.msk.f32.mxu1 %vm1604_vm3, %v1577_v11  ;;  %v1563_v26 = vadd.f32 %v3873_v56, %v1540_v18  ;;  %v1580_v40 = vmax.f32 %v1564_v17, 0.0  ;;  %v3304_v8 = vpop.f32.mrf.mxu1  ;;  %v1514_v19 = vpop.permute.xlu1 %1513 }
 0x100   : > { %v3318_v30 = vpop.f32.mrf.mxu0  ;;  %3340 = vmatmul.mubr.msk.f32.vlgmr.msra.gmra.mxu1 %vm1604_vm3, %v1578_v16  ;;  %v1170_v18 = vadd.f32 %v1169_v58, %v3865_v42 }
 0x101   : > { %v1542_v37 = vadd.f32 %v1526_v20, %v1407_v23  ;;  %v1410_v43 = vadd.f32 %v3318_v30, %v1145_v22  ;;  %v1579_v45 = vmax.f32 %v1563_v26, 0.0  ;;  %v1566_v49 = vadd.f32 %v3873_v56, %v1543_v25  ;;  %v1179_v26 = vpop.f32.mrf.mxu1 }
 0x102   : > { %v1354_v46 = vpop.f32.mrf.mxu0  ;;  %v1534_v25 = vmul.f32 %v3861_v38, %v1499_v3  ;;  %v1185_v23 = vadd.f32 %v3304_v8, %v3844_v12  ;;  %v1180_v31 = vadd.f32 %v1179_v26, %v3846_v14 }
 0x103   : > { %v1565_v51 = vadd.f32 %v3873_v56, %v1542_v37  ;;  %v1545_v52 = vadd.f32 %v1529_v21, %v1410_v43  ;;  %v1409_v47 = vadd.f32 %v1354_v46, %v1140_v28  ;;  %3342 = vmatprep.mubr.msk.f32.mxu1 %vm1604_vm3, %v1579_v45  ;;  %v1582_v63 = vmax.f32 %v1566_v49, 0.0  ;;  %v1509_v28 = vpop.permute.xlu0 %1508 }
 0x104   : > { %v3321_v35 = vpop.f32.mrf.mxu0  ;;  %3343 = vmatmul.mubr.msk.f32.gmra.mxu1 %vm1604_vm3, %v1580_v40  ;;  %v1536_v46 = vmul.f32 %v3861_v38, %v1509_v28 }
 0x105   : > { %v1581_v54 = vmax.f32 %v1565_v51, 0.0  ;;  %v1544_v29 = vadd.f32 %v1528_v44, %v1409_v47  ;;  %v1412_v41 = vadd.f32 %v3321_v35, %v1155_v24  ;;  %v1568_v59 = vadd.f32 %v3873_v56, %v1545_v52 }
 0x106   : > { %v1364_v60 = vpop.f32.mrf.mxu0  ;;  %v1537_v44 = vmul.f32 %v3861_v38, %v1514_v19 }
 0x107   : > { %v1567_v0 = vadd.f32 %v3873_v56, %v1544_v29  ;;  %v1547_v1 = vadd.f32 %v1531_v27, %v1412_v41  ;;  %v1411_v2 = vadd.f32 %v1364_v60, %v1150_v53  ;;  %3345 = vmatprep.mubr.msk.f32.mxu1 %vm1604_vm3, %v1581_v54  ;;  %v1584_v9 = vmax.f32 %v1568_v59, 0.0 }
 0x108   : > { %v3324_v50 = vpop.f32.mrf.mxu0  ;;  %3346 = vmatmul.mubr.msk.f32.gmra.mxu1 %vm1604_vm3, %v1582_v63 }
 0x109   : > { %v1583_v5 = vmax.f32 %v1567_v0, 0.0  ;;  %v1546_v34 = vadd.f32 %v1530_v55, %v1411_v2  ;;  %v1414_v62 = vadd.f32 %v3324_v50, %v1165_v57  ;;  %v1570_v11 = vadd.f32 %v3873_v56, %v1547_v1  ;;  %v1814_v55 = vld [vmem:[%s4151_s11] sm:$0xff] }
 0x10a   : > { %v1374_v10 = vpop.f32.mrf.mxu0  ;;  %3369 = vmatprep.subr.mxu0 %v1814_v55  ;;  %v2998_v57 = vld [vmem:[%s4150_s10] ss:$0 sm:$0xff] }
 0x10b   : > { %v1569_v13 = vadd.f32 %v3873_v56, %v1546_v34  ;;  %v1549_v16 = vadd.f32 %v1533_v32, %v1414_v62  ;;  %v1413_v17 = vadd.f32 %v1374_v10, %v1160_v4  ;;  %3348 = vmatprep.mubr.msk.f32.mxu1 %vm1604_vm3, %v1583_v5  ;;  %v1586_v33 = vmax.f32 %v1570_v11, 0.0  ;;  %3370 = vmatpush3.msra.mxu0 %v1814_v55 }
 0x10c   : > { %v3327_v15 = vpop.f32.mrf.mxu0  ;;  %3349 = vmatmul.mubr.msk.f32.gmra.mxu1 %vm1604_vm3, %v1584_v9 }
 0x10d   : > { %v1585_v20 = vmax.f32 %v1569_v13, 0.0  ;;  %v1548_v22 = vadd.f32 %v1532_v6, %v1413_v17  ;;  %v1416_v39 = vadd.f32 %v3327_v15, %v1175_v7  ;;  %v1572_v30 = vadd.f32 %v3873_v56, %v1549_v16 }
 0x10e   : > { %v1384_v21 = vpop.f32.mrf.mxu0 }
 0x10f   : > { %v1571_v37 = vadd.f32 %v3873_v56, %v1548_v22  ;;  %v1551_v43 = vadd.f32 %v1535_v36, %v1416_v39  ;;  %v1415_v42 = vadd.f32 %v1384_v21, %v1170_v18  ;;  %3351 = vmatprep.mubr.msk.f32.mxu1 %vm1604_vm3, %v1585_v20  ;;  %v1588_v48 = vmax.f32 %v1572_v30, 0.0 }
 0x110   : > { %v3330_v24 = vpop.f32.mrf.mxu0  ;;  %3352 = vmatmul.mubr.msk.f32.gmra.mxu1 %vm1604_vm3, %v1586_v33 }
 0x111   : > { %v1587_v40 = vmax.f32 %v1571_v37, 0.0  ;;  %v1550_v45 = vadd.f32 %v1534_v25, %v1415_v42  ;;  %v1418_v12 = vadd.f32 %v3330_v24, %v1185_v23  ;;  %v1574_v51 = vadd.f32 %v3873_v56, %v1551_v43 }
 0x112   : > { %v1394_v49 = vpop.f32.mrf.mxu0 }
 0x113   : > { %v1573_v52 = vadd.f32 %v3873_v56, %v1550_v45  ;;  %v1553_v47 = vadd.f32 %v1537_v44, %v1418_v12  ;;  %v1417_v27 = vadd.f32 %v1394_v49, %v1180_v31  ;;  %3354 = vmatprep.mubr.msk.f32.mxu1 %vm1604_vm3, %v1587_v40  ;;  %v1590_v14 = vmax.f32 %v1574_v51, 0.0  ;;  %v2019_v49 = vld [vmem:[%s4153_s13 + $0x8] sm:$0xff]  ;;  %v2018_v51 = vld [vmem:[%s4153_s13] sm:$0xff] }
 0x114   : > { %3355 = vmatmul.mubr.msk.f32.gmra.mxu1 %vm1604_vm3, %v1588_v48  ;;  %v2020_v48 = vld [vmem:[%s4153_s13 + $0x10] sm:$0xff] }
 0x115   : > { %v1589_v35 = vmax.f32 %v1573_v52, 0.0  ;;  %v1552_v53 = vadd.f32 %v1536_v46, %v1417_v27  ;;  %v1576_v54 = vadd.f32 %v3873_v56, %v1553_v47  ;;  %v3015_v47 = vld [vmem:[%s4152_s12] ss:$0 sm:$0xff] }
 0x117   : > { %v1575_v29 = vadd.f32 %v3873_v56, %v1552_v53  ;;  %3357 = vmatprep.mubr.msk.f32.mxu1 %vm1604_vm3, %v1589_v35  ;;  %v1592_v41 = vmax.f32 %v1576_v54, 0.0  ;;  %v2021_v56 = vld [vmem:[%s4153_s13 + $0x18] sm:$0xff] }
 0x118   : > { %3358 = vmatmul.mubr.msk.f32.gmra.mxu1 %vm1604_vm3, %v1590_v14  ;;  %3395 = vmatprep.subr.mxu1 %v2021_v56 }
 0x119   : > { %v1591_v38 = vmax.f32 %v1575_v29, 0.0  ;;  %3396 = vmatpush3.msra.mxu1 %v2021_v56 }
 0x11a   : > { %3397 = vmatprep.subr.mxu1 %v2020_v48 }
 0x11b   : > { %3360 = vmatprep.mubr.msk.f32.mxu1 %vm1604_vm3, %v1591_v38  ;;  %3398 = vmatpush3.msra.mxu1 %v2020_v48 }
 0x11c   : > { %3361 = vmatmul.mubr.msk.f32.gmra.mxu1 %vm1604_vm3, %v1592_v41  ;;  %3399 = vmatprep.subr.mxu1 %v2019_v49 }
 0x11d   : > { %3400 = vmatpush3.msra.mxu1 %v2019_v49 }
 0x11e   : > { %3401 = vmatprep.subr.mxu1 %v2018_v51 }
 0x11f   : > { %3402 = vmatpush3.msra.mxu1 %v2018_v51 }
 0x1c0   : > { %v3341_v58 = vpop.f32.mrf.mxu1 }
 0x1c1   : > { %v1725_v59 = vadd.f32 %v3341_v58, %v2998_v57 }
 0x1c2   : > { %v1719_v60 = vpop.f32.mrf.mxu1 }
 0x1c3   : > { %v1720_v61 = vadd.f32 %v2998_v57, %v1719_v60  ;;  %v1799_v1 = vmax.f32 %v1725_v59, 0.0  ;;  %v2459_v59 = vlaneseq }
 0x1c4   : > { %v3344_v0 = vpop.f32.mrf.mxu1 }
 0x1c5   : > { %v1798_v63 = vmax.f32 %v1720_v61, 0.0  ;;  %v1735_v2 = vadd.f32 %v3344_v0, %v2998_v57 }
 0x1c6   : > { %v1729_v32 = vpop.f32.mrf.mxu1 }
 0x1c7   : > { %3371 = vmatprep.mubr.msk.f32.mxu0 %vm1604_vm3, %v1798_v63  ;;  %v1730_v50 = vadd.f32 %v2998_v57, %v1729_v32  ;;  %v1801_v5 = vmax.f32 %v1735_v2, 0.0 }
 0x1c8   : > { %3372 = vmatmul.mubr.msk.f32.vlgmr.msra.gmra.mxu0 %vm1604_vm3, %v1799_v1  ;;  %v3347_v3 = vpop.f32.mrf.mxu1  ;;  %v2462_v1 = vshrl.u32 %v2459_v59, 7 }
 0x1c9   : > { %v1800_v4 = vmax.f32 %v1730_v50, 0.0  ;;  %v1745_v34 = vadd.f32 %v3347_v3, %v2998_v57 }
 0x1ca   : > { %v1739_v62 = vpop.f32.mrf.mxu1 }
 0x1cb   : > { %v1740_v6 = vadd.f32 %v2998_v57, %v1739_v62  ;;  %3374 = vmatprep.mubr.msk.f32.mxu0 %vm1604_vm3, %v1800_v4  ;;  %v1803_v9 = vmax.f32 %v1745_v34, 0.0  ;;  %v2466_v4 = vmul.u32 4, %v2462_v1 }
 0x1cc   : > { %v3350_v7 = vpop.f32.mrf.mxu1  ;;  %3375 = vmatmul.mubr.msk.f32.gmra.mxu0 %vm1604_vm3, %v1801_v5 }
 0x1cd   : > { %v1802_v8 = vmax.f32 %v1740_v6, 0.0  ;;  %v1755_v10 = vadd.f32 %v3350_v7, %v2998_v57  ;;  %v3995_v7 = vand.u32 127, %v2459_v59 }
 0x1ce   : > { %v1749_v11 = vpop.f32.mrf.mxu1 }
 0x1cf   : > { %v1750_v13 = vadd.f32 %v2998_v57, %v1749_v11  ;;  %3377 = vmatprep.mubr.msk.f32.mxu0 %vm1604_vm3, %v1802_v8  ;;  %v1805_v36 = vmax.f32 %v1755_v10, 0.0  ;;  %v2474_v8 = vadd.s32 4, %v2466_v4  ;;  %vm2470_vm4 = vcmp.ge.s32.totalorder %v3995_v7, %v2466_v4 }
 0x1d0   : > { %v3353_v16 = vpop.f32.mrf.mxu1  ;;  %3378 = vmatmul.mubr.msk.f32.gmra.mxu0 %vm1604_vm3, %v1803_v9 }
 0x1d1   : > { %v1804_v17 = vmax.f32 %v1750_v13, 0.0  ;;  %v1765_v15 = vadd.f32 %v3353_v16, %v2998_v57  ;;  %vm2478_vm5 = vcmp.lt.s32.totalorder %v3995_v7, %v2474_v8 }
 0x1d2   : > { %v1759_v18 = vpop.f32.mrf.mxu1  ;;  %vm2482_vm6 = vmand %vm2470_vm4, %vm2478_vm5 }
 0x1d3   : > { %v1760_v19 = vadd.f32 %v2998_v57, %v1759_v18  ;;  %3380 = vmatprep.mubr.msk.f32.mxu0 %vm1604_vm3, %v1804_v17  ;;  %v1807_v39 = vmax.f32 %v1765_v15, 0.0  ;;  %v3548_v15 = vmov 1.0   ;;  %v2463_v18 = vadd.s32 8, %v2462_v1 }
 0x1d4   : > { %v3356_v20 = vpop.f32.mrf.mxu1  ;;  %3381 = vmatmul.mubr.msk.f32.gmra.mxu0 %vm1604_vm3, %v1805_v36 }
 0x1d5   : > { %v1806_v22 = vmax.f32 %v1760_v19, 0.0  ;;  %v1775_v25 = vadd.f32 %v3356_v20, %v2998_v57  ;;  %v2464_v19 = vadd.s32 16, %v2462_v1  ;;  %v2467_v20 = vmul.u32 4, %v2463_v18 }
 0x1d6   : > { %v1769_v23 = vpop.f32.mrf.mxu1 }
 0x1d7   : > { %v1770_v26 = vadd.f32 %v2998_v57, %v1769_v23  ;;  %3383 = vmatprep.mubr.msk.f32.mxu0 %vm1604_vm3, %v1806_v22  ;;  %v1809_v28 = vmax.f32 %v1775_v25, 0.0  ;;  %v2465_v22 = vadd.s32 24, %v2462_v1  ;;  %v2475_v25 = vadd.s32 4, %v2467_v20 }
 0x1d8   : > { %v3359_v30 = vpop.f32.mrf.mxu1  ;;  %3384 = vmatmul.mubr.msk.f32.gmra.mxu0 %vm1604_vm3, %v1807_v39  ;;  %v2468_v39 = vmul.u32 4, %v2464_v19  ;;  %vm2471_vm7 = vcmp.ge.s32.totalorder %v3995_v7, %v2467_v20 }
 0x1d9   : > { %v1808_v21 = vmax.f32 %v1770_v26, 0.0  ;;  %v1785_v33 = vadd.f32 %v3359_v30, %v2998_v57  ;;  %v2469_v23 = vmul.u32 4, %v2465_v22  ;;  %vm2479_vm8 = vcmp.lt.s32.totalorder %v3995_v7, %v2475_v25 }
 0x1da   : > { %v1779_v37 = vpop.f32.mrf.mxu1  ;;  %v2476_v26 = vadd.s32 4, %v2468_v39  ;;  %vm2472_vm9 = vcmp.ge.s32.totalorder %v3995_v7, %v2468_v39  ;;  %vm2483_vm11 = vmand %vm2471_vm7, %vm2479_vm8 }
 0x1db   : > { %v1780_v43 = vadd.f32 %v2998_v57, %v1779_v37  ;;  %3386 = vmatprep.mubr.msk.f32.mxu0 %vm1604_vm3, %v1808_v21  ;;  %v1811_v24 = vmax.f32 %v1785_v33, 0.0  ;;  %v2477_v30 = vadd.s32 4, %v2469_v23  ;;  %vm2473_vm13 = vcmp.ge.s32.totalorder %v3995_v7, %v2469_v23  ;;  %v2241_v21 = vld [vmem:[%s4155_s15 + $0x18] sm:$0xff]  ;;  %v2239_v33 = vld [vmem:[%s4155_s15 + $0x8] sm:$0xff]  ;;  %v2238_v37 = vld [vmem:[%s4155_s15] sm:$0xff] }
 0x1dc   : > { %v3362_v42 = vpop.f32.mrf.mxu1  ;;  %3387 = vmatmul.mubr.msk.f32.gmra.mxu0 %vm1604_vm3, %v1809_v28  ;;  %vm2480_vm10 = vcmp.lt.s32.totalorder %v3995_v7, %v2476_v26  ;;  %3427 = vmatprep.subr.mxu0 %v2241_v21  ;;  %v2240_v28 = vld [vmem:[%s4155_s15 + $0x10] sm:$0xff]  ;;  %v2694_v23 = vld [vmem:[%s4159_s19 + $0x18] sm:$0xff] }
 0x1dd   : > { %v1810_v44 = vmax.f32 %v1780_v43, 0.0  ;;  %v1795_v31 = vadd.f32 %v3362_v42, %v2998_v57  ;;  %vm2484_vm12 = vmand %vm2472_vm9, %vm2480_vm10  ;;  %vm2481_vm14 = vcmp.lt.s32.totalorder %v3995_v7, %v2477_v30  ;;  %3428 = vmatpush3.msra.mxu0 %v2241_v21  ;;  %v2582_v43 = vld [vmem:[%s4157_s17 + $0x18] sm:$0xff]  ;;  %v2581_v42 = vld [vmem:[%s4157_s17 + $0x10] sm:$0xff] }
 0x1de   : > { %v1789_v40 = vpop.f32.mrf.mxu1  ;;  %vm2485_vm15 = vmand %vm2473_vm13, %vm2481_vm14  ;;  %3429 = vmatprep.subr.mxu0 %v2240_v28  ;;  %v2693_v26 = vld [vmem:[%s4159_s19 + $0x10] sm:$0xff]  ;;  %v2692_v30 = vld [vmem:[%s4159_s19 + $0x8] sm:$0xff] }
 0x1df   : > { %v1790_v45 = vadd.f32 %v2998_v57, %v1789_v40  ;;  %3389 = vmatprep.mubr.msk.f32.mxu0 %vm1604_vm3, %v1810_v44  ;;  %v1813_v46 = vmax.f32 %v1795_v31, 0.0  ;;  %3430 = vmatpush3.msra.mxu0 %v2240_v28  ;;  %v2580_v44 = vld [vmem:[%s4157_s17 + $0x8] sm:$0xff]  ;;  %v3032_v31 = vld [vmem:[%s4154_s14] ss:$0 sm:$0xff] }
 0x1e0   : > { %3390 = vmatmul.mubr.msk.f32.gmra.mxu0 %vm1604_vm3, %v1811_v24  ;;  %3431 = vmatprep.subr.mxu0 %v2239_v33  ;;  %v2579_v24 = vld [vmem:[%s4157_s17] sm:$0xff] }
 0x1e1   : > { %v1812_v12 = vmax.f32 %v1790_v45, 0.0  ;;  %3432 = vmatpush3.msra.mxu0 %v2239_v33  ;;  %v2691_v21 = vld [vmem:[%s4159_s19] sm:$0xff] }
 0x1e2   : > { %3433 = vmatprep.subr.mxu0 %v2238_v37  ;;  %v3049_v28 = vld [vmem:[%s4156_s16] ss:$0 sm:$0xff] }
 0x1e3   : > { %3392 = vmatprep.mubr.msk.f32.mxu0 %vm1604_vm3, %v1812_v12  ;;  %3434 = vmatpush3.msra.mxu0 %v2238_v37 }
 0x1e4   : > { %3393 = vmatmul.mubr.msk.f32.gmra.mxu0 %vm1604_vm3, %v1813_v46 }
 0x288   : > { %v3373_v52 = vpop.f32.mrf.mxu0 }
 0x289   : > { %v3968_v53 = vadd.f32 %v3373_v52, %v3015_v47 }
 0x28a   : > { %v1939_v27 = vpop.f32.mrf.mxu0 }
 0x28b   : > { %v3966_v35 = vadd.f32 %v3015_v47, %v1939_v27 }
 0x28c   : > { %v3376_v14 = vpop.f32.mrf.mxu0 }
 0x28d   : > { %3403 = vmatprep.mubr.msk.f32.mxu1 %vm1604_vm3, %v3966_v35  ;;  %v3976_v38 = vadd.f32 %v3376_v14, %v3015_v47 }
 0x28e   : > { %3404 = vmatmul.mubr.msk.f32.vlgmr.msra.gmra.mxu1 %vm1604_vm3, %v3968_v53  ;;  %v1949_v54 = vpop.f32.mrf.mxu0 }
 0x28f   : > { %v3974_v29 = vadd.f32 %v3015_v47, %v1949_v54 }
 0x290   : > { %v3379_v41 = vpop.f32.mrf.mxu0 }
 0x291   : > { %3406 = vmatprep.mubr.msk.f32.mxu1 %vm1604_vm3, %v3974_v29  ;;  %v3984_v57 = vadd.f32 %v3379_v41, %v3015_v47 }
 0x292   : > { %v1959_v55 = vpop.f32.mrf.mxu0  ;;  %3407 = vmatmul.mubr.msk.f32.gmra.mxu1 %vm1604_vm3, %v3976_v38 }
 0x293   : > { %v3982_v56 = vadd.f32 %v3015_v47, %v1959_v55 }
 0x294   : > { %v3382_v58 = vpop.f32.mrf.mxu0 }
 0x295   : > { %3409 = vmatprep.mubr.msk.f32.mxu1 %vm1604_vm3, %v3982_v56  ;;  %v1975_v63 = vadd.f32 %v3382_v58, %v3015_v47 }
 0x296   : > { %v1969_v60 = vpop.f32.mrf.mxu0  ;;  %3410 = vmatmul.mubr.msk.f32.gmra.mxu1 %vm1604_vm3, %v3984_v57 }
 0x297   : > { %v1970_v61 = vadd.f32 %v3015_v47, %v1969_v60 }
 0x298   : > { %v3385_v0 = vpop.f32.mrf.mxu0 }
 0x299   : > { %3412 = vmatprep.mubr.msk.f32.mxu1 %vm1604_vm3, %v1970_v61  ;;  %v1985_v50 = vadd.f32 %v3385_v0, %v3015_v47 }
 0x29a   : > { %v1979_v2 = vpop.f32.mrf.mxu0  ;;  %3413 = vmatmul.mubr.msk.f32.gmra.mxu1 %vm1604_vm3, %v1975_v63 }
 0x29b   : > { %v1980_v32 = vadd.f32 %v3015_v47, %v1979_v2 }
 0x29c   : > { %v3388_v3 = vpop.f32.mrf.mxu0 }
 0x29d   : > { %3415 = vmatprep.mubr.msk.f32.mxu1 %vm1604_vm3, %v1980_v32  ;;  %v1995_v62 = vadd.f32 %v3388_v3, %v3015_v47 }
 0x29e   : > { %v1989_v5 = vpop.f32.mrf.mxu0  ;;  %3416 = vmatmul.mubr.msk.f32.gmra.mxu1 %vm1604_vm3, %v1985_v50 }
 0x29f   : > { %v1990_v34 = vadd.f32 %v3015_v47, %v1989_v5 }
 0x2a0   : > { %v3391_v6 = vpop.f32.mrf.mxu0 }
 0x2a1   : > { %3418 = vmatprep.mubr.msk.f32.mxu1 %vm1604_vm3, %v1990_v34  ;;  %v2005_v11 = vadd.f32 %v3391_v6, %v3015_v47 }
 0x2a2   : > { %v1999_v9 = vpop.f32.mrf.mxu0  ;;  %3419 = vmatmul.mubr.msk.f32.gmra.mxu1 %vm1604_vm3, %v1995_v62 }
 0x2a3   : > { %v2000_v10 = vadd.f32 %v3015_v47, %v1999_v9 }
 0x2a4   : > { %v3394_v13 = vpop.f32.mrf.mxu0 }
 0x2a5   : > { %v2015_v16 = vadd.f32 %v3394_v13, %v3015_v47  ;;  %3421 = vmatprep.mubr.msk.f32.mxu1 %vm1604_vm3, %v2000_v10 }
 0x2a6   : > { %v2009_v17 = vpop.f32.mrf.mxu0  ;;  %3422 = vmatmul.mubr.msk.f32.gmra.mxu1 %vm1604_vm3, %v2005_v11 }
 0x2a7   : > { %v2010_v36 = vadd.f32 %v3015_v47, %v2009_v17  ;;  %3459 = vmatprep.subr.mxu1 %v2015_v16 }
 0x2a8   : > { %3460 = vmatpush3.msra.mxu1 %v2015_v16 }
 0x2a9   : > { %3424 = vmatprep.mubr.msk.f32.mxu1 %vm1604_vm3, %v2010_v36  ;;  %3461 = vmatprep.subr.mxu1 %v2010_v36 }
 0x2aa   : > { %3425 = vmatmul.mubr.msk.f32.gmra.mxu1 %vm1604_vm3, %v2015_v16 }
 0x2ab   : > { %3462 = vmatpush3.msra.mxu1 %v2010_v36  ;;  %3491 = vmatprep.mubr.msk.f32.mxu1 %vm2482_vm6, %v3548_v15 }
 0x2ac   : > { %3463 = vmatprep.subr.mxu1 %v2005_v11 }
 0x2ad   : > { %3464 = vmatpush3.msra.mxu1 %v2005_v11 }
 0x2ae   : > { %3465 = vmatprep.subr.mxu1 %v2000_v10 }
 0x2af   : > { %3466 = vmatpush3.msra.mxu1 %v2000_v10 }
 0x2b0   : > { %3467 = vmatprep.subr.mxu1 %v1995_v62 }
 0x2b1   : > { %3468 = vmatpush3.msra.mxu1 %v1995_v62 }
 0x2b2   : > { %3469 = vmatprep.subr.mxu1 %v1990_v34 }
 0x2b3   : > { %3470 = vmatpush3.msra.mxu1 %v1990_v34 }
 0x2b4   : > { %3471 = vmatprep.subr.mxu1 %v1985_v50 }
 0x2b5   : > { %3472 = vmatpush3.msra.mxu1 %v1985_v50 }
 0x2b6   : > { %3473 = vmatprep.subr.mxu1 %v1980_v32 }
 0x2b7   : > { %3474 = vmatpush3.msra.mxu1 %v1980_v32 }
 0x2b8   : > { %3475 = vmatprep.subr.mxu1 %v1975_v63 }
 0x2b9   : > { %3476 = vmatpush3.msra.mxu1 %v1975_v63 }
 0x2ba   : > { %3477 = vmatprep.subr.mxu1 %v1970_v61 }
 0x2bb   : > { %3478 = vmatpush3.msra.mxu1 %v1970_v61 }
 0x2bc   : > { %3479 = vmatprep.subr.mxu1 %v3984_v57 }
 0x2bd   : > { %3480 = vmatpush3.msra.mxu1 %v3984_v57 }
 0x2be   : > { %3481 = vmatprep.subr.mxu1 %v3982_v56 }
 0x2bf   : > { %3482 = vmatpush3.msra.mxu1 %v3982_v56 }
 0x2c0   : > { %3483 = vmatprep.subr.mxu1 %v3976_v38 }
 0x2c1   : > { %3484 = vmatpush3.msra.mxu1 %v3976_v38 }
 0x2c2   : > { %3485 = vmatprep.subr.mxu1 %v3974_v29 }
 0x2c3   : > { %3486 = vmatpush3.msra.mxu1 %v3974_v29 }
 0x2c4   : > { %3487 = vmatprep.subr.mxu1 %v3968_v53 }
 0x2c5   : > { %3488 = vmatpush3.msra.mxu1 %v3968_v53 }
 0x2c6   : > { %3489 = vmatprep.subr.mxu1 %v3966_v35 }
 0x2c7   : > { %3490 = vmatpush3.msra.mxu1 %v3966_v35 }
 0x2c8   : > { %3492 = vmatmul.mubr.msk.f32.vlgmr.msra.gmra.mxu1 %vm2483_vm11, %v3548_v15  ;;  %3497 = vmatprep.subr.mxu1 %v2582_v43 }
 0x2c9   : > { %3494 = vmatprep.mubr.msk.f32.mxu1 %vm2484_vm12, %v3548_v15  ;;  %3498 = vmatpush3.msra.mxu1 %v2582_v43 }
 0x2ca   : > { %3499 = vmatprep.subr.mxu1 %v2581_v42 }
 0x2cb   : > { %3500 = vmatpush3.msra.mxu1 %v2581_v42 }
 0x2cc   : > { %3495 = vmatmul.mubr.msk.f32.gmra.mxu1 %vm2485_vm15, %v3548_v15  ;;  %3501 = vmatprep.subr.mxu1 %v2580_v44 }
 0x2cd   : > { %3502 = vmatpush3.msra.mxu1 %v2580_v44 }
 0x2ce   : > { %3503 = vmatprep.subr.mxu1 %v2579_v24 }
 0x2cf   : > { %3504 = vmatpush3.msra.mxu1 %v2579_v24 }
 0x2d0   : > { %3511 = vmatprep.subr.mxu1 %v2694_v23 }
 0x34e   : > { %v3405_v40 = vpop.f32.mrf.mxu1 }
 0x34f   : > { %v2149_v45 = vadd.f32 %v3405_v40, %v3032_v31 }
 0x350   : > { %v2143_v12 = vpop.f32.mrf.mxu1 }
 0x351   : > { %v2144_v46 = vadd.f32 %v3032_v31, %v2143_v12  ;;  %v2223_v51 = vmax.f32 %v2149_v45, 0.0 }
 0x352   : > { %v3408_v49 = vpop.f32.mrf.mxu1 }
 0x353   : > { %v2222_v48 = vmax.f32 %v2144_v46, 0.0  ;;  %v2159_v52 = vadd.f32 %v3408_v49, %v3032_v31 }
 0x354   : > { %v2153_v47 = vpop.f32.mrf.mxu1 }
 0x355   : > { %3435 = vmatprep.mubr.msk.f32.mxu0 %vm1604_vm3, %v2222_v48  ;;  %v2154_v27 = vadd.f32 %v3032_v31, %v2153_v47  ;;  %v2225_v14 = vmax.f32 %v2159_v52, 0.0 }
 0x356   : > { %3436 = vmatmul.mubr.msk.f32.vlgmr.msra.gmra.mxu0 %vm1604_vm3, %v2223_v51  ;;  %v3411_v35 = vpop.f32.mrf.mxu1 }
 0x357   : > { %v2224_v53 = vmax.f32 %v2154_v27, 0.0  ;;  %v2169_v54 = vadd.f32 %v3411_v35, %v3032_v31 }
 0x358   : > { %v2163_v29 = vpop.f32.mrf.mxu1 }
 0x359   : > { %v2164_v38 = vadd.f32 %v3032_v31, %v2163_v29  ;;  %3438 = vmatprep.mubr.msk.f32.mxu0 %vm1604_vm3, %v2224_v53  ;;  %v2227_v56 = vmax.f32 %v2169_v54, 0.0 }
 0x35a   : > { %v3414_v41 = vpop.f32.mrf.mxu1  ;;  %3439 = vmatmul.mubr.msk.f32.gmra.mxu0 %vm1604_vm3, %v2225_v14 }
 0x35b   : > { %v2226_v55 = vmax.f32 %v2164_v38, 0.0  ;;  %v2179_v57 = vadd.f32 %v3414_v41, %v3032_v31 }
 0x35c   : > { %v2173_v58 = vpop.f32.mrf.mxu1 }
 0x35d   : > { %v2174_v59 = vadd.f32 %v3032_v31, %v2173_v58  ;;  %3441 = vmatprep.mubr.msk.f32.mxu0 %vm1604_vm3, %v2226_v55  ;;  %v2229_v63 = vmax.f32 %v2179_v57, 0.0 }
 0x35e   : > { %v3417_v60 = vpop.f32.mrf.mxu1  ;;  %3442 = vmatmul.mubr.msk.f32.gmra.mxu0 %vm1604_vm3, %v2227_v56 }
 0x35f   : > { %v2228_v61 = vmax.f32 %v2174_v59, 0.0  ;;  %v2189_v0 = vadd.f32 %v3417_v60, %v3032_v31 }
 0x360   : > { %v2183_v1 = vpop.f32.mrf.mxu1 }
 0x361   : > { %v2184_v2 = vadd.f32 %v3032_v31, %v2183_v1  ;;  %3444 = vmatprep.mubr.msk.f32.mxu0 %vm1604_vm3, %v2228_v61  ;;  %v2231_v3 = vmax.f32 %v2189_v0, 0.0  ;;  %v3074_v0 = vld [vmem:[%s4158_s18] ss:$0 sm:$0xff] }
 0x362   : > { %v3420_v32 = vpop.f32.mrf.mxu1  ;;  %3445 = vmatmul.mubr.msk.f32.gmra.mxu0 %vm1604_vm3, %v2229_v63 }
 0x363   : > { %v2230_v50 = vmax.f32 %v2184_v2, 0.0  ;;  %v2199_v4 = vadd.f32 %v3420_v32, %v3032_v31 }
 0x364   : > { %v2193_v5 = vpop.f32.mrf.mxu1 }
 0x365   : > { %v2194_v34 = vadd.f32 %v3032_v31, %v2193_v5  ;;  %3447 = vmatprep.mubr.msk.f32.mxu0 %vm1604_vm3, %v2230_v50  ;;  %v2233_v7 = vmax.f32 %v2199_v4, 0.0 }
 0x366   : > { %v3423_v62 = vpop.f32.mrf.mxu1  ;;  %3448 = vmatmul.mubr.msk.f32.gmra.mxu0 %vm1604_vm3, %v2231_v3 }
 0x367   : > { %v2232_v6 = vmax.f32 %v2194_v34, 0.0  ;;  %v2209_v8 = vadd.f32 %v3423_v62, %v3032_v31 }
 0x368   : > { %v2203_v9 = vpop.f32.mrf.mxu1 }
 0x369   : > { %v2204_v10 = vadd.f32 %v3032_v31, %v2203_v9  ;;  %3450 = vmatprep.mubr.msk.f32.mxu0 %vm1604_vm3, %v2232_v6  ;;  %v2235_v16 = vmax.f32 %v2209_v8, 0.0 }
 0x36a   : > { %v3426_v11 = vpop.f32.mrf.mxu1  ;;  %3451 = vmatmul.mubr.msk.f32.gmra.mxu0 %vm1604_vm3, %v2233_v7 }
 0x36b   : > { %v2234_v13 = vmax.f32 %v2204_v10, 0.0  ;;  %v2219_v17 = vadd.f32 %v3426_v11, %v3032_v31  ;;  %v3079_v10 = vld [vmem:[%s4160_s20] ss:$0 sm:$0xff] }
 0x36c   : > { %v2213_v36 = vpop.f32.mrf.mxu1 }
 0x36d   : > { %v2214_v15 = vadd.f32 %v3032_v31, %v2213_v36  ;;  %3453 = vmatprep.mubr.msk.f32.mxu0 %vm1604_vm3, %v2234_v13  ;;  %v2237_v19 = vmax.f32 %v2219_v17, 0.0 }
 0x36e   : > { %3454 = vmatmul.mubr.msk.f32.gmra.mxu0 %vm1604_vm3, %v2235_v16 }
 0x36f   : > { %v2236_v18 = vmax.f32 %v2214_v15, 0.0 }
 0x371   : > { %3456 = vmatprep.mubr.msk.f32.mxu0 %vm1604_vm3, %v2236_v18 }
 0x372   : > { %3457 = vmatmul.mubr.msk.f32.gmra.mxu0 %vm1604_vm3, %v2237_v19 }
 0x388   : > { %v3493_v20 = vpop.f32.mrf.mxu1 }
 0x38a   : > { %v2560_v22 = vpop.f32.mrf.mxu1 }
 0x38b   : > { %3505 = vmatprep.mubr.msk.f32.mxu1 %vm1604_vm3, %v2560_v22 }
 0x38c   : > { %v3496_v39 = vpop.f32.mrf.mxu1  ;;  %3506 = vmatmul.mubr.msk.f32.vlgmr.msra.gmra.mxu1 %vm1604_vm3, %v3493_v20 }
 0x38d   : > { %3512 = vmatpush3.msra.mxu1 %v2694_v23 }
 0x38e   : > { %v2570_v25 = vpop.f32.mrf.mxu1  ;;  %3513 = vmatprep.subr.mxu1 %v2693_v26 }
 0x38f   : > { %3508 = vmatprep.mubr.msk.f32.mxu1 %vm1604_vm3, %v2570_v25  ;;  %3514 = vmatpush3.msra.mxu1 %v2693_v26 }
 0x390   : > { %3509 = vmatmul.mubr.msk.f32.gmra.mxu1 %vm1604_vm3, %v3496_v39  ;;  %3515 = vmatprep.subr.mxu1 %v2692_v30 }
 0x391   : > { %3516 = vmatpush3.msra.mxu1 %v2692_v30 }
 0x392   : > { %3517 = vmatprep.subr.mxu1 %v2691_v21 }
 0x393   : > { %3518 = vmatpush3.msra.mxu1 %v2691_v21 }
 0x416   : > { %v3437_v33 = vpop.f32.mrf.mxu0 }
 0x417   : > { %v2369_v37 = vadd.f32 %v3437_v33, %v3049_v28 }
 0x418   : > { %v2363_v43 = vpop.f32.mrf.mxu0 }
 0x419   : > { %2444 = vst.msk [vmem:[%s4088_s1 + $0x8] sm:$0xff] %vm2442_vm0, %v2369_v37  ;;  %v2364_v42 = vadd.f32 %v3049_v28, %v2363_v43 }
 0x41a   : > { %v3440_v44 = vpop.f32.mrf.mxu0 }
 0x41b   : > { %2443 = vst.msk [vmem:[%s4088_s1] sm:$0xff] %vm2442_vm0, %v2364_v42  ;;  %v2379_v24 = vadd.f32 %v3440_v44, %v3049_v28 }
 0x41c   : > { %v2373_v31 = vpop.f32.mrf.mxu0 }
 0x41d   : > { %2446 = vst.msk [vmem:[%s4088_s1 + $0x18] sm:$0xff] %vm2442_vm0, %v2379_v24  ;;  %v2374_v40 = vadd.f32 %v3049_v28, %v2373_v31 }
 0x41e   : > { %v3443_v45 = vpop.f32.mrf.mxu0 }
 0x41f   : > { %2445 = vst.msk [vmem:[%s4088_s1 + $0x10] sm:$0xff] %vm2442_vm0, %v2374_v40  ;;  %v2389_v12 = vadd.f32 %v3443_v45, %v3049_v28 }
 0x420   : > { %v2383_v46 = vpop.f32.mrf.mxu0 }
 0x421   : > { %2448 = vst.msk [vmem:[%s4088_s1 + $0x28] sm:$0xff] %vm2442_vm0, %v2389_v12  ;;  %v2384_v48 = vadd.f32 %v3049_v28, %v2383_v46 }
 0x422   : > { %v3446_v49 = vpop.f32.mrf.mxu0 }
 0x423   : > { %2447 = vst.msk [vmem:[%s4088_s1 + $0x20] sm:$0xff] %vm2442_vm0, %v2384_v48  ;;  %v2399_v51 = vadd.f32 %v3446_v49, %v3049_v28 }
 0x424   : > { %v2393_v52 = vpop.f32.mrf.mxu0 }
 0x425   : > { %2450 = vst.msk [vmem:[%s4088_s1 + $0x38] sm:$0xff] %vm2442_vm0, %v2399_v51  ;;  %v2394_v47 = vadd.f32 %v3049_v28, %v2393_v52 }
 0x426   : > { %v3449_v27 = vpop.f32.mrf.mxu0 }
 0x427   : > { %2449 = vst.msk [vmem:[%s4088_s1 + $0x30] sm:$0xff] %vm2442_vm0, %v2394_v47  ;;  %v2409_v35 = vadd.f32 %v3449_v27, %v3049_v28 }
 0x428   : > { %v2403_v53 = vpop.f32.mrf.mxu0 }
 0x429   : > { %2452 = vst.msk [vmem:[%s4088_s1 + $0x48] sm:$0xff] %vm2442_vm0, %v2409_v35  ;;  %v2404_v14 = vadd.f32 %v3049_v28, %v2403_v53 }
 0x42a   : > { %v3452_v54 = vpop.f32.mrf.mxu0 }
 0x42b   : > { %2451 = vst.msk [vmem:[%s4088_s1 + $0x40] sm:$0xff] %vm2442_vm0, %v2404_v14  ;;  %v2419_v29 = vadd.f32 %v3452_v54, %v3049_v28 }
 0x42c   : > { %v2413_v38 = vpop.f32.mrf.mxu0 }
 0x42d   : > { %2454 = vst.msk [vmem:[%s4088_s1 + $0x58] sm:$0xff] %vm2442_vm0, %v2419_v29  ;;  %v2414_v41 = vadd.f32 %v3049_v28, %v2413_v38 }
 0x42e   : > { %v3455_v55 = vpop.f32.mrf.mxu0 }
 0x42f   : > { %2453 = vst.msk [vmem:[%s4088_s1 + $0x50] sm:$0xff] %vm2442_vm0, %v2414_v41  ;;  %v2429_v56 = vadd.f32 %v3455_v55, %v3049_v28 }
 0x430   : > { %v2423_v57 = vpop.f32.mrf.mxu0 }
 0x431   : > { %2456 = vst.msk [vmem:[%s4088_s1 + $0x68] sm:$0xff] %vm2442_vm0, %v2429_v56  ;;  %v2424_v58 = vadd.f32 %v3049_v28, %v2423_v57 }
 0x432   : > { %v3458_v59 = vpop.f32.mrf.mxu0 }
 0x433   : > { %2455 = vst.msk [vmem:[%s4088_s1 + $0x60] sm:$0xff] %vm2442_vm0, %v2424_v58  ;;  %v2439_v60 = vadd.f32 %v3458_v59, %v3049_v28 }
 0x434   : > { %v2433_v61 = vpop.f32.mrf.mxu0 }
 0x435   : > { %2458 = vst.msk [vmem:[%s4088_s1 + $0x78] sm:$0xff] %vm2442_vm0, %v2439_v60  ;;  %v2434_v63 = vadd.f32 %v3049_v28, %v2433_v61 }
 0x437   : > { %2457 = vst.msk [vmem:[%s4088_s1 + $0x70] sm:$0xff] %vm2442_vm0, %v2434_v63 }
 0x44c   : > { %v3507_v1 = vpop.f32.mrf.mxu1 }
 0x44d   : > { %v2674_v2 = vadd.f32 %v3507_v1, %v3074_v0 }
 0x44e   : > { %v2668_v32 = vpop.f32.mrf.mxu1 }
 0x44f   : > { %v2669_v50 = vadd.f32 %v3074_v0, %v2668_v32  ;;  %v2688_v5 = vmax.f32 %v2674_v2, 0.0 }
 0x450   : > { %v3510_v3 = vpop.f32.mrf.mxu1 }
 0x451   : > { %v2687_v4 = vmax.f32 %v2669_v50, 0.0  ;;  %v2684_v34 = vadd.f32 %v3510_v3, %v3074_v0 }
 0x452   : > { %v2678_v62 = vpop.f32.mrf.mxu1 }
 0x453   : > { %v2679_v6 = vadd.f32 %v3074_v0, %v2678_v62  ;;  %3519 = vmatprep.mubr.msk.f32.mxu1 %vm1604_vm3, %v2687_v4  ;;  %v2690_v8 = vmax.f32 %v2684_v34, 0.0 }
 0x454   : > { %3520 = vmatmul.mubr.msk.f32.vlgmr.msra.gmra.mxu1 %vm1604_vm3, %v2688_v5 }
 0x455   : > { %v2689_v7 = vmax.f32 %v2679_v6, 0.0 }
 0x457   : > { %3522 = vmatprep.mubr.msk.f32.mxu1 %vm1604_vm3, %v2689_v7 }
 0x458   : > { %3523 = vmatmul.mubr.msk.f32.gmra.mxu1 %vm1604_vm3, %v2690_v8 }
 0x514   : > { %v3521_v9 = vpop.f32.mrf.mxu1 }
 0x515   : > { %v2786_v16 = vadd.f32 %v3521_v9, %v3079_v10 }
 0x516   : > { %v2780_v11 = vpop.f32.mrf.mxu1 }
 0x517   : > { %v2781_v13 = vadd.f32 %v3079_v10, %v2780_v11  ;;  %2801 = vst.msk [vmem:[%s765_s30 + $0x8] sm:$0xff] %vm2799_vm1, %v2786_v16 }
 0x518   : > { %v3524_v17 = vpop.f32.mrf.mxu1 }
 0x519   : > { %2800 = vst.msk [vmem:[%s765_s30] sm:$0xff] %vm2799_vm1, %v2781_v13  ;;  %v2796_v18 = vadd.f32 %v3524_v17, %v3079_v10 }
 0x51a   : > { %v2790_v36 = vpop.f32.mrf.mxu1 }
 0x51b   : > { %v2791_v15 = vadd.f32 %v3079_v10, %v2790_v36  ;;  %2803 = vst.msk [vmem:[%s765_s30 + $0x18] sm:$0xff] %vm2799_vm1, %v2796_v18 }
 0x51d   : > { %2802 = vst.msk [vmem:[%s765_s30 + $0x10] sm:$0xff] %vm2799_vm1, %v2791_v15 }
 0x51e PF: > { %s33_s3 = sadd.s32 1, %s3545_s3  }
 0x51f   : > { %p30_p5 = scmp.ge.s32.totalorder %s33_s3, 4  }
 0x521   :  { %32 = sbr.rel (!%p30_p5) target bundleno = 8 (0x8), region = 155 }

</bundles_post_ra>
